<compile_context>
chip_gen: v7x
topology: tpu7x:2x2x1
jax: 0.10.0
libtpu: 0.0.40
codegen_flags: <defaults>
</compile_context>

<pallas_src>
import jax
import jax.numpy as jnp
from jax.experimental import pallas as pl
from jax.experimental.pallas import tpu as pltpu

D1, D2, D3 = 1024, 512, 256

# Packed small-parameter vector layout: [b1 | b2 | b3 | w4^T | b4], all f32.
OFF_B1 = 0
OFF_B2 = OFF_B1 + D1          # 1024
OFF_B3 = OFF_B2 + D2          # 1536
OFF_W4 = OFF_B3 + D3          # 1792
OFF_B4 = OFF_W4 + D3          # 2048
PACK_W = OFF_B4 + 1           # 2049


def _round_up(x, m):
    return (x + m - 1) // m * m


def _mish(x):
    # Mish(x) = x * tanh(softplus(x)).  With u = e^x:
    #   tanh(softplus(x)) = u*(u+2) / (u*u + 2*u + 2)
    # -> one EUP exp + one approx reciprocal instead of exp/log1p/tanh.
    u = jnp.exp(jnp.minimum(x, 20.0))
    t = u * (u + 2.0) * pl.reciprocal(u * u + 2.0 * u + 2.0, approx=True)
    return jnp.where(x > 20.0, x, x * t)


def discriminator_kernel(x_ref, p_ref, w1_ref, w2_ref, w3_ref, o_ref):
    # x_ref: (TB, data_size) f32 tile; weights are VMEM-resident bf16 blocks
    # (constant index_map -> fetched once, reused for every batch tile).
    x = x_ref[...].astype(jnp.bfloat16)

    # layer 1: Linear(data_size, 1024) + Mish
    h = jnp.dot(x, w1_ref[...], preferred_element_type=jnp.float32)
    h = _mish(h + p_ref[:, OFF_B1:OFF_B1 + D1])

    # layer 2: Linear(1024, 512) + Mish
    h = jnp.dot(h.astype(jnp.bfloat16), w2_ref[...],
                preferred_element_type=jnp.float32)
    h = _mish(h + p_ref[:, OFF_B2:OFF_B2 + D2])

    # layer 3: Linear(512, 256) + Mish
    h = jnp.dot(h.astype(jnp.bfloat16), w3_ref[...],
                preferred_element_type=jnp.float32)
    h = _mish(h + p_ref[:, OFF_B3:OFF_B3 + D3])

    # adv_layer: Linear(256, 1) as elementwise multiply + lane reduction.
    w4 = p_ref[:, OFF_W4:OFF_W4 + D3]      # (1, 256) — PyTorch weight layout
    b4 = p_ref[:, OFF_B4:OFF_B4 + 1]       # (1, 1)
    o_ref[...] = jnp.sum(h * w4, axis=-1, keepdims=True) + b4


def _vmem_budget(batch_tile, data_size):
    """VMEM limit derived from the kernel's actual footprint (+ headroom)."""
    f32, bf16 = 4, 2
    nbuf = 2  # BlockSpec double-buffering
    weights = nbuf * (data_size * D1 + D1 * D2 + D2 * D3) * bf16
    io = nbuf * (batch_tile * data_size * f32 + PACK_W * f32 + batch_tile * f32)
    acts = 2 * batch_tile * (D1 + D2 + D3) * f32   # live activations / temps
    total = weights + io + acts + (4 << 20)
    return int(min(max(total, 16 << 20), 100 << 20))


def make_discriminator_params(key, data_size):
    """Synthetic parameters matching the PyTorch Discriminator shapes.

    Large Linear weights are pre-transposed to [in, out] and cast to bf16.
    Biases + the final (1, 256) weight are packed into one f32 vector.
    """
    dims = [(data_size, D1), (D1, D2), (D2, D3), (D3, 1)]
    keys = jax.random.split(key, 2 * len(dims))
    ws, bs = [], []
    for i, (din, dout) in enumerate(dims):
        bound = 1.0 / (din ** 0.5)
        w = jax.random.uniform(keys[2 * i], (din, dout),
                               minval=-bound, maxval=bound, dtype=jnp.float32)
        b = jax.random.uniform(keys[2 * i + 1], (1, dout),
                               minval=-bound, maxval=bound, dtype=jnp.float32)
        ws.append(w)
        bs.append(b)
    w1, w2, w3, w4 = ws
    b1, b2, b3, b4 = bs
    p_packed = jnp.concatenate([b1, b2, b3, w4.reshape(1, D3), b4], axis=1)
    assert p_packed.shape == (1, PACK_W)
    return (w1.astype(jnp.bfloat16),
            w2.astype(jnp.bfloat16),
            w3.astype(jnp.bfloat16),
            p_packed)


def discriminator_forward(x, params, *, batch_tile=256):
    """batch_tile: 256 for v6e/v7x (MXU height), 128 recommended on v5e."""
    w1, w2, w3, p_packed = params
    batch, data_size = x.shape
    assert w1.shape == (data_size, D1)

    tb = min(batch_tile, _round_up(batch, 8))
    padded = _round_up(batch, tb)
    if padded != batch:
        x = jnp.pad(x, ((0, padded - batch), (0, 0)))
    grid = (padded // tb,)

    out = pl.pallas_call(
        discriminator_kernel,
        out_shape=jax.ShapeDtypeStruct((padded, 1), jnp.float32),
        grid_spec=pltpu.PrefetchScalarGridSpec(
            num_scalar_prefetch=0,
            grid=grid,
            in_specs=[
                # streamed batch tile
                pl.BlockSpec((tb, data_size), lambda i: (i, 0)),
                # packed biases + final-layer weight (resident)
                pl.BlockSpec((1, PACK_W), lambda i: (0, 0)),
                # big weights: constant block index => fetched once, resident
                pl.BlockSpec((data_size, D1), lambda i: (0, 0)),
                pl.BlockSpec((D1, D2), lambda i: (0, 0)),
                pl.BlockSpec((D2, D3), lambda i: (0, 0)),
            ],
            out_specs=pl.BlockSpec((tb, 1), lambda i: (i, 0)),
        ),
        compiler_params=pltpu.CompilerParams(
            dimension_semantics=("parallel",),
            vmem_limit_bytes=_vmem_budget(tb, data_size),
        ),
    )(x, p_packed, w1, w2, w3)
    return out[:batch]


def discriminator_reference(x, params):
    """Pure-JAX reference (bf16 weights / f32 accum, canonical Mish)."""
    w1, w2, w3, p = params
    b1 = p[:, OFF_B1:OFF_B1 + D1]
    b2 = p[:, OFF_B2:OFF_B2 + D2]
    b3 = p[:, OFF_B3:OFF_B3 + D3]
    w4 = p[:, OFF_W4:OFF_W4 + D3]
    b4 = p[:, OFF_B4:OFF_B4 + 1]

    def mish(v):
        return v * jnp.tanh(jax.nn.softplus(v))

    h = mish(jnp.dot(x.astype(jnp.bfloat16), w1,
                     preferred_element_type=jnp.float32) + b1)
    h = mish(jnp.dot(h.astype(jnp.bfloat16), w2,
                     preferred_element_type=jnp.float32) + b2)
    h = mish(jnp.dot(h.astype(jnp.bfloat16), w3,
                     preferred_element_type=jnp.float32) + b3)
    return jnp.sum(h * w4, axis=-1, keepdims=True) + b4


if __name__ == "__main__":
    batch = 16
    data_size = 64

    key = jax.random.PRNGKey(0)
    kx, kp = jax.random.split(key)
    x = jax.random.normal(kx, (batch, data_size), dtype=jnp.float32)
    params = make_discriminator_params(kp, data_size)

    # TB=8 so the toy batch runs as a 2-step grid, exercising resident-weight
    # streaming; production sizes would use the 256 (v6e/v7x) / 128 (v5e) default.
    out = jax.block_until_ready(discriminator_forward(x, params, batch_tile=8))
    ref = discriminator_reference(x, params)

    assert out.shape == (batch, 1)
    assert jnp.max(jnp.abs(out - ref)) < 1e-2, "Pallas output mismatch vs JAX reference"

    print("KERNEL_OK")
</pallas_src>

<mosaic_0001>
module attributes {stable_mosaic.version = 11 : i64} {
  func.func @discriminator_kernel(%arg0: i32, %arg1: memref<8x64xf32, #tpu.memory_space<vmem>>, %arg2: memref<1x2049xf32, #tpu.memory_space<vmem>>, %arg3: memref<64x1024xbf16, #tpu.memory_space<vmem>>, %arg4: memref<1024x512xbf16, #tpu.memory_space<vmem>>, %arg5: memref<512x256xbf16, #tpu.memory_space<vmem>>, %arg6: memref<8x1xf32, #tpu.memory_space<vmem>>) attributes {dimension_semantics = [#tpu.dimension_semantics<parallel>], iteration_bounds = array<i64: 2>, scalar_prefetch = 0 : i64, scratch_operands = 0 : i64, tpu.core_type = #tpu.core_type<tc>, window_params = [{transform_indices = @transform_0, window_bounds = array<i64: 8, 64>}, {pipeline_mode = #tpu.pipeline_mode<synchronous>, transform_indices = @transform_1, window_bounds = array<i64: 1, 2049>}, {pipeline_mode = #tpu.pipeline_mode<synchronous>, transform_indices = @transform_2, window_bounds = array<i64: 64, 1024>}, {pipeline_mode = #tpu.pipeline_mode<synchronous>, transform_indices = @transform_3, window_bounds = array<i64: 1024, 512>}, {pipeline_mode = #tpu.pipeline_mode<synchronous>, transform_indices = @transform_4, window_bounds = array<i64: 512, 256>}, {transform_indices = @transform_5, window_bounds = array<i64: 8, 1>}]} {
    %c0 = arith.constant 0 : index
    %c0_0 = arith.constant 0 : index
    %0 = vector.load %arg1[%c0, %c0_0] : memref<8x64xf32, #tpu.memory_space<vmem>>, vector<8x64xf32>
    %1 = arith.truncf %0 : vector<8x64xf32> to vector<8x64xbf16>
    %c0_1 = arith.constant 0 : index
    %c0_2 = arith.constant 0 : index
    %2 = vector.load %arg3[%c0_1, %c0_2] : memref<64x1024xbf16, #tpu.memory_space<vmem>>, vector<64x1024xbf16>
    %cst = arith.constant dense<0.000000e+00> : vector<8x1024xf32>
    %3 = tpu.matmul %1, %2, %cst {dimension_numbers = #tpu.dot_dimension_numbers<[1], [0], [0], [1], [0, 0, 1, 1], [], []>} : vector<8x64xbf16>, vector<64x1024xbf16>, vector<8x1024xf32> -> vector<8x1024xf32>
    %c0_3 = arith.constant 0 : index
    %c0_4 = arith.constant 0 : index
    %4 = vector.load %arg2[%c0_3, %c0_4] : memref<1x2049xf32, #tpu.memory_space<vmem>>, vector<1x1024xf32>
    %5 = vector.broadcast %4 : vector<1x1024xf32> to vector<8x1024xf32>
    %6 = arith.addf %3, %5 : vector<8x1024xf32>
    %cst_5 = arith.constant 2.000000e+01 : f32
    %7 = vector.broadcast %cst_5 : f32 to vector<8x1024xf32>
    %8 = arith.minimumf %6, %7 : vector<8x1024xf32>
    %9 = math.exp %8 : vector<8x1024xf32>
    %cst_6 = arith.constant 2.000000e+00 : f32
    %10 = vector.broadcast %cst_6 : f32 to vector<8x1024xf32>
    %11 = arith.addf %9, %10 : vector<8x1024xf32>
    %12 = arith.mulf %9, %11 : vector<8x1024xf32>
    %13 = arith.mulf %9, %9 : vector<8x1024xf32>
    %cst_7 = arith.constant 2.000000e+00 : f32
    %14 = vector.broadcast %cst_7 : f32 to vector<8x1024xf32>
    %15 = arith.mulf %14, %9 : vector<8x1024xf32>
    %16 = arith.addf %13, %15 : vector<8x1024xf32>
    %cst_8 = arith.constant 2.000000e+00 : f32
    %17 = vector.broadcast %cst_8 : f32 to vector<8x1024xf32>
    %18 = arith.addf %16, %17 : vector<8x1024xf32>
    %19 = tpu.reciprocal %18 {approx = true} : vector<8x1024xf32> -> vector<8x1024xf32>
    %20 = arith.mulf %12, %19 : vector<8x1024xf32>
    %cst_9 = arith.constant 2.000000e+01 : f32
    %21 = vector.broadcast %cst_9 : f32 to vector<8x1024xf32>
    %22 = arith.cmpf ogt, %6, %21 : vector<8x1024xf32>
    %23 = arith.mulf %6, %20 : vector<8x1024xf32>
    %24 = arith.select %22, %6, %23 : vector<8x1024xi1>, vector<8x1024xf32>
    %25 = arith.truncf %24 : vector<8x1024xf32> to vector<8x1024xbf16>
    %c0_10 = arith.constant 0 : index
    %c0_11 = arith.constant 0 : index
    %26 = vector.load %arg4[%c0_10, %c0_11] : memref<1024x512xbf16, #tpu.memory_space<vmem>>, vector<1024x512xbf16>
    %cst_12 = arith.constant dense<0.000000e+00> : vector<8x512xf32>
    %27 = tpu.matmul %25, %26, %cst_12 {dimension_numbers = #tpu.dot_dimension_numbers<[1], [0], [0], [1], [0, 0, 1, 1], [], []>} : vector<8x1024xbf16>, vector<1024x512xbf16>, vector<8x512xf32> -> vector<8x512xf32>
    %c0_13 = arith.constant 0 : index
    %c1024 = arith.constant 1024 : index
    %28 = vector.load %arg2[%c0_13, %c1024] : memref<1x2049xf32, #tpu.memory_space<vmem>>, vector<1x512xf32>
    %29 = vector.broadcast %28 : vector<1x512xf32> to vector<8x512xf32>
    %30 = arith.addf %27, %29 : vector<8x512xf32>
    %cst_14 = arith.constant 2.000000e+01 : f32
    %31 = vector.broadcast %cst_14 : f32 to vector<8x512xf32>
    %32 = arith.minimumf %30, %31 : vector<8x512xf32>
    %33 = math.exp %32 : vector<8x512xf32>
    %cst_15 = arith.constant 2.000000e+00 : f32
    %34 = vector.broadcast %cst_15 : f32 to vector<8x512xf32>
    %35 = arith.addf %33, %34 : vector<8x512xf32>
    %36 = arith.mulf %33, %35 : vector<8x512xf32>
    %37 = arith.mulf %33, %33 : vector<8x512xf32>
    %cst_16 = arith.constant 2.000000e+00 : f32
    %38 = vector.broadcast %cst_16 : f32 to vector<8x512xf32>
    %39 = arith.mulf %38, %33 : vector<8x512xf32>
    %40 = arith.addf %37, %39 : vector<8x512xf32>
    %cst_17 = arith.constant 2.000000e+00 : f32
    %41 = vector.broadcast %cst_17 : f32 to vector<8x512xf32>
    %42 = arith.addf %40, %41 : vector<8x512xf32>
    %43 = tpu.reciprocal %42 {approx = true} : vector<8x512xf32> -> vector<8x512xf32>
    %44 = arith.mulf %36, %43 : vector<8x512xf32>
    %cst_18 = arith.constant 2.000000e+01 : f32
    %45 = vector.broadcast %cst_18 : f32 to vector<8x512xf32>
    %46 = arith.cmpf ogt, %30, %45 : vector<8x512xf32>
    %47 = arith.mulf %30, %44 : vector<8x512xf32>
    %48 = arith.select %46, %30, %47 : vector<8x512xi1>, vector<8x512xf32>
    %49 = arith.truncf %48 : vector<8x512xf32> to vector<8x512xbf16>
    %c0_19 = arith.constant 0 : index
    %c0_20 = arith.constant 0 : index
    %50 = vector.load %arg5[%c0_19, %c0_20] : memref<512x256xbf16, #tpu.memory_space<vmem>>, vector<512x256xbf16>
    %cst_21 = arith.constant dense<0.000000e+00> : vector<8x256xf32>
    %51 = tpu.matmul %49, %50, %cst_21 {dimension_numbers = #tpu.dot_dimension_numbers<[1], [0], [0], [1], [0, 0, 1, 1], [], []>} : vector<8x512xbf16>, vector<512x256xbf16>, vector<8x256xf32> -> vector<8x256xf32>
    %c0_22 = arith.constant 0 : index
    %c1536 = arith.constant 1536 : index
    %52 = vector.load %arg2[%c0_22, %c1536] : memref<1x2049xf32, #tpu.memory_space<vmem>>, vector<1x256xf32>
    %53 = vector.broadcast %52 : vector<1x256xf32> to vector<8x256xf32>
    %54 = arith.addf %51, %53 : vector<8x256xf32>
    %cst_23 = arith.constant 2.000000e+01 : f32
    %55 = vector.broadcast %cst_23 : f32 to vector<8x256xf32>
    %56 = arith.minimumf %54, %55 : vector<8x256xf32>
    %57 = math.exp %56 : vector<8x256xf32>
    %cst_24 = arith.constant 2.000000e+00 : f32
    %58 = vector.broadcast %cst_24 : f32 to vector<8x256xf32>
    %59 = arith.addf %57, %58 : vector<8x256xf32>
    %60 = arith.mulf %57, %59 : vector<8x256xf32>
    %61 = arith.mulf %57, %57 : vector<8x256xf32>
    %cst_25 = arith.constant 2.000000e+00 : f32
    %62 = vector.broadcast %cst_25 : f32 to vector<8x256xf32>
    %63 = arith.mulf %62, %57 : vector<8x256xf32>
    %64 = arith.addf %61, %63 : vector<8x256xf32>
    %cst_26 = arith.constant 2.000000e+00 : f32
    %65 = vector.broadcast %cst_26 : f32 to vector<8x256xf32>
    %66 = arith.addf %64, %65 : vector<8x256xf32>
    %67 = tpu.reciprocal %66 {approx = true} : vector<8x256xf32> -> vector<8x256xf32>
    %68 = arith.mulf %60, %67 : vector<8x256xf32>
    %cst_27 = arith.constant 2.000000e+01 : f32
    %69 = vector.broadcast %cst_27 : f32 to vector<8x256xf32>
    %70 = arith.cmpf ogt, %54, %69 : vector<8x256xf32>
    %71 = arith.mulf %54, %68 : vector<8x256xf32>
    %72 = arith.select %70, %54, %71 : vector<8x256xi1>, vector<8x256xf32>
    %c0_28 = arith.constant 0 : index
    %c1792 = arith.constant 1792 : index
    %73 = vector.load %arg2[%c0_28, %c1792] : memref<1x2049xf32, #tpu.memory_space<vmem>>, vector<1x256xf32>
    %c0_29 = arith.constant 0 : index
    %c2048 = arith.constant 2048 : index
    %74 = vector.load %arg2[%c0_29, %c2048] : memref<1x2049xf32, #tpu.memory_space<vmem>>, vector<1x1xf32>
    %75 = vector.broadcast %73 : vector<1x256xf32> to vector<8x256xf32>
    %76 = arith.mulf %72, %75 : vector<8x256xf32>
    %cst_30 = arith.constant dense<0.000000e+00> : vector<8xf32>
    %77 = vector.multi_reduction <add>, %76, %cst_30 [1] : vector<8x256xf32> to vector<8xf32>
    %78 = vector.shape_cast %77 : vector<8xf32> to vector<8x1xf32>
    %79 = vector.broadcast %74 : vector<1x1xf32> to vector<8x1xf32>
    %80 = arith.addf %78, %79 : vector<8x1xf32>
    %c0_31 = arith.constant 0 : index
    %c0_32 = arith.constant 0 : index
    %81 = vector.load %arg6[%c0_31, %c0_32] : memref<8x1xf32, #tpu.memory_space<vmem>>, vector<8x1xf32>
    tpu.vector_store %arg6[%c0_31, %c0_32], %80 {strides = array<i32>} : memref<8x1xf32, #tpu.memory_space<vmem>>, vector<8x1xf32>,
    return
  }
  func.func @transform_0(%arg0: i32) -> (i32, i32) {
    %c0_i32 = arith.constant 0 : i32
    %c0_i32_0 = arith.constant 0 : i32
    return %arg0, %c0_i32 : i32, i32
  }
  func.func @transform_1(%arg0: i32) -> (i32, i32) {
    %c0_i32 = arith.constant 0 : i32
    %c0_i32_0 = arith.constant 0 : i32
    %c0_i32_1 = arith.constant 0 : i32
    return %c0_i32, %c0_i32_0 : i32, i32
  }
  func.func @transform_2(%arg0: i32) -> (i32, i32) {
    %c0_i32 = arith.constant 0 : i32
    %c0_i32_0 = arith.constant 0 : i32
    %c0_i32_1 = arith.constant 0 : i32
    return %c0_i32, %c0_i32_0 : i32, i32
  }
  func.func @transform_3(%arg0: i32) -> (i32, i32) {
    %c0_i32 = arith.constant 0 : i32
    %c0_i32_0 = arith.constant 0 : i32
    %c0_i32_1 = arith.constant 0 : i32
    return %c0_i32, %c0_i32_0 : i32, i32
  }
  func.func @transform_4(%arg0: i32) -> (i32, i32) {
    %c0_i32 = arith.constant 0 : i32
    %c0_i32_0 = arith.constant 0 : i32
    %c0_i32_1 = arith.constant 0 : i32
    return %c0_i32, %c0_i32_0 : i32, i32
  }
  func.func @transform_5(%arg0: i32) -> (i32, i32) {
    %c0_i32 = arith.constant 0 : i32
    %c0_i32_0 = arith.constant 0 : i32
    return %arg0, %c0_i32 : i32, i32
  }
}

</mosaic_0001>

<bundles_post_ra>
// kernel: tpu_custom_call.1
= control target key start
LH: loop header
LB: loop body
LE: loop exit
PB: predicated region body
PF: predicated region fallthrough
CT: control target
= control target key end

     0   :  { %10 = vsyncpa [#allocation3], 0  ;;  %s5040_s0 = inlined_call_operand.hbm [shape: f32[16,64], index: 0, kind: input, shape index: {}]   ;;  %s5041_s1 = inlined_call_operand.hbm [shape: f32[1,2049], index: 1, kind: input, shape index: {}]   ;;  %s5042_s2 = inlined_call_operand.hbm [shape: bf16[64,1024], index: 2, kind: input, shape index: {}]   ;;  %s5043_s3 = inlined_call_operand.hbm [shape: bf16[1024,512], index: 3, kind: input, shape index: {}]   ;;  %s5044_s4 = inlined_call_operand.hbm [shape: bf16[512,256], index: 4, kind: input, shape index: {}]   ;;  %s5045_s5 = inlined_call_operand.vmem [shape: f32[16,1], index: 5, kind: output, shape index: {}]  }
   0x1   :  { %12 = vsyncpa [#allocation3 + $0x1], 0 }
   0x2   :  { %13 = vsyncpa [#allocation5], 0 }
   0x3   :  { %14 = vsyncpa [#allocation8], 0  ;;  %s4661_s18 = smov 0   ;;  %s4663_s19 = smov 0  }
   0x4   :  { %s4665_s20 = smov 0   ;;  %s4667_s21 = smov 0  }
   0x5 LB: > { %s4619_s22 = smov [#allocation4]   ;;  %s4682_s24 = sadd.s32 4294967295, %s4617_s21   ;;  %s4617_s21 = sphi %s4667_s21, %s5062_s21   ;;  %s4613_s20 = sphi %s4665_s20, %s5061_s20   ;;  %s4609_s19 = sphi %s4663_s19, %s5060_s19   ;;  %s4605_s18 = sphi %s4661_s18, %s5059_s18  }
   0x6   : > { %s174_s23 = sshll.u32 %s4619_s22, 4  ;;  %p3404_p0 = scmp.ge.s32.totalorder %s4617_s21, 1  ;;  %s175_s23 = int_to_ptr.vmem [resolvable:$true] %s174_s23 }
   0x7   : > { %p5046_p1 = scmp.eq.s32.totalorder %s4682_s24, 0  ;;  %p161_p2 = scmp.lt.s32.totalorder %s4617_s21, 3 }
   0x8   : > { %s4620_s26 = smov [#allocation7]   ;;  %s4621_s29 = smov [#allocation6]  }
   0x9   : > { %p4687_p3 = pnand %p3404_p0, %p161_p2  ;;  %s197_s27 = sshll.u32 %s4620_s26, 4  ;;  %s4693_s27 = int_to_ptr.vmem [resolvable:$true] %s197_s27 }
   0xa   : > { %s184_s30 = sshll.u32 %s4621_s29, 4  ;;  %s4433_s8 = scalar_lea.hbm %s5041_s1, 272  ;;  %s4701_s30 = int_to_ptr.vmem [resolvable:$true] %s184_s30 }
   0xb   : > { %s5048_s25 = scalar_select %p4687_p3, 1, 0 }
   0xc   : > { %p3828_p4 = pneg %p4687_p3  ;;  %p4434_p6 = scmp.ne.s32.totalorder %s5041_s1, %s4433_s8 }
   0xd   : > { %p4440_p10 = scmp.lt.u32.totalorder %s4433_s8, %s5041_s1 }
   0xe   : > { %p4697_p5 = pnand %p3828_p4, %p5046_p1 }
  0x10   : > { %p4711_p7 = pneg %p4697_p5 }
  0x12   : > { %p4436_p8 = pnand %p4711_p7, %p4434_p6 }
  0x14   : > { %p4437_p9 = pneg %p4436_p8 }
  0x16   : > { %p4442_p11 = pnand %p4440_p10, %p4437_p9 }
  0x18   : > { %4445 = shalt.err (!%p4442_p11)
}
  0x19   : > { %s4446_s14 = scalar_lea.vmem %s175_s23, 272  ;;  %s4453_s15 = scalar_lea.vmem %s175_s23, 288 }
  0x1a   : > { %p4447_p12 = scmp.ne.s32.totalorder %s175_s23, %s4446_s14  ;;  %p4454_p2 = scmp.lt.s32.totalorder %s175_s23, %s175_s23 }
  0x1b   : > { %p4455_p4 = scmp.lt.s32.totalorder %s4453_s15, %s4446_s14 }
  0x1c   : > { %p4449_p13 = pnand %p4447_p12, %p4711_p7 }
  0x1d   : > { %p4456_p1 = por %p4455_p4, %p4454_p2 }
  0x1e   : > { %p4450_p0 = pneg %p4449_p13 }
  0x20   : > { %p4457_p3 = pnand %p4456_p1, %p4450_p0 }
  0x22   : > { %4460 = shalt.err (!%p4457_p3)
}
  0x23   : > { %3831 = dma.hbm_to_vmem [thread:$0]  (!%p4697_p5), %s5041_s1, 272, %s175_s23, [#allocation5]  }
  0x24   : > { %s4461_s29 = scalar_lea.hbm %s5043_s3, 32768 }
  0x25   : > { %p4462_p6 = scmp.ne.s32.totalorder %s5043_s3, %s4461_s29  ;;  %p4468_p1 = scmp.lt.u32.totalorder %s4461_s29, %s5043_s3 }
  0x27   : > { %p4464_p8 = pnand %p4462_p6, %p4711_p7 }
  0x29   : > { %p4465_p9 = pneg %p4464_p8 }
  0x2b   : > { %p4470_p3 = pnand %p4468_p1, %p4465_p9 }
  0x2d   : > { %4473 = shalt.err (!%p4470_p3)
}
  0x2e   : > { %s4474_s23 = scalar_lea.vmem %s4693_s27, 32768  ;;  %p4482_p13 = scmp.lt.s32.totalorder %s4693_s27, %s4693_s27 }
  0x2f   : > { %p4475_p10 = scmp.ne.s32.totalorder %s4693_s27, %s4474_s23  ;;  %p4483_p0 = scmp.lt.s32.totalorder %s4474_s23, %s4474_s23 }
  0x31   : > { %p4477_p11 = pnand %p4475_p10, %p4711_p7  ;;  %p4484_p2 = por %p4483_p0, %p4482_p13 }
  0x33   : > { %p4478_p12 = pneg %p4477_p11 }
  0x35   : > { %p4485_p4 = pnand %p4484_p2, %p4478_p12 }
  0x37   : > { %4488 = shalt.err (!%p4485_p4)
}
  0x38   : > { %s4622_s10 = smov 256   ;;  %s4623_s12 = smov 16  }
  0x39   : > { %3837 = dma.hbm_to_vmem [thread:$0]  (!%p4697_p5), %s5043_s3, 32768, %s4693_s27, [#allocation8], %s4622_s10, %s4622_s10, %s4623_s12  }
  0x3a   : > { %s4489_s17 = scalar_lea.hbm %s5042_s2, 4096 }
  0x3b   : > { %p4490_p6 = scmp.ne.s32.totalorder %s5042_s2, %s4489_s17  ;;  %p4496_p1 = scmp.lt.u32.totalorder %s4489_s17, %s5042_s2 }
  0x3d   : > { %p4492_p8 = pnand %p4490_p6, %p4711_p7 }
  0x3f   : > { %p4493_p9 = pneg %p4492_p8 }
  0x41   : > { %p4498_p3 = pnand %p4496_p1, %p4493_p9 }
  0x43   : > { %4501 = shalt.err (!%p4498_p3)
}
  0x44   : > { %s4502_s27 = scalar_lea.vmem %s4701_s30, 4096  ;;  %p4510_p13 = scmp.lt.s32.totalorder %s4701_s30, %s4701_s30 }
  0x45   : > { %p4503_p10 = scmp.ne.s32.totalorder %s4701_s30, %s4502_s27  ;;  %p4511_p0 = scmp.lt.s32.totalorder %s4502_s27, %s4502_s27 }
  0x47   : > { %p4505_p11 = pnand %p4503_p10, %p4711_p7  ;;  %p4512_p2 = por %p4511_p0, %p4510_p13 }
  0x49   : > { %p4506_p12 = pneg %p4505_p11 }
  0x4b   : > { %p4513_p4 = pnand %p4512_p2, %p4506_p12 }
  0x4d   : > { %4516 = shalt.err (!%p4513_p4)
}
  0x4e   : > { %s4624_s7 = smov 512   ;;  %s4625_s8 = smov 32  }
  0x4f   : > { %3834 = dma.hbm_to_vmem [thread:$0]  (!%p4697_p5), %s5042_s2, 4096, %s4701_s30, [#allocation5], %s4624_s7, %s4624_s7, %s4625_s8  }
  0x50   : > { %s4626_s10 = smov [#allocation9]   ;;  %s4517_s15 = scalar_lea.hbm %s5044_s4, 8192 }
  0x51   : > { %s210_s12 = sshll.u32 %s4626_s10, 4  ;;  %p4518_p6 = scmp.ne.s32.totalorder %s5044_s4, %s4517_s15  ;;  %s211_s12 = int_to_ptr.vmem [resolvable:$true] %s210_s12 }
  0x52   : > { %p4524_p1 = scmp.lt.u32.totalorder %s4517_s15, %s5044_s4 }
  0x53   : > { %p4520_p8 = pnand %p4518_p6, %p4711_p7 }
  0x55   : > { %p4521_p9 = pneg %p4520_p8 }
  0x57   : > { %p4526_p3 = pnand %p4524_p1, %p4521_p9 }
  0x59   : > { %4529 = shalt.err (!%p4526_p3)
}
  0x5a   : > { %s4530_s30 = scalar_lea.vmem %s211_s12, 8192  ;;  %p4538_p13 = scmp.lt.s32.totalorder %s211_s12, %s211_s12 }
  0x5b   : > { %p4531_p10 = scmp.ne.s32.totalorder %s211_s12, %s4530_s30  ;;  %p4539_p0 = scmp.lt.s32.totalorder %s4530_s30, %s4530_s30 }
  0x5d   : > { %p4533_p11 = pnand %p4531_p10, %p4711_p7  ;;  %p4540_p2 = por %p4539_p0, %p4538_p13 }
  0x5f   : > { %p4534_p12 = pneg %p4533_p11 }
  0x61   : > { %p4541_p4 = pnand %p4540_p2, %p4534_p12 }
  0x63   : > { %4544 = shalt.err (!%p4541_p4)
}
  0x64   : > { %s4627_s29 = smov 128   ;;  %s4628_s11 = smov 8  }
  0x65   : > { %3840 = dma.hbm_to_vmem [thread:$0]  (!%p4697_p5), %s5044_s4, 8192, %s211_s12, [#allocation8], %s4627_s29, %s4627_s29, %s4628_s11  }
  0x66   : > { %s4792_s7 = sadd.s32 1, %s4617_s21   ;;  %s27_s8 = sadd.s32 1, %s4613_s20 }
  0x67   : > { %s24_s9 = ssub.s32 %s4617_s21, %s4792_s7  ;;  %p34_p7 = scmp.ne.s32.totalorder %s4613_s20, %s4609_s19 }
  0x68   : > { %p25_p6 = scmp.eq.s32.totalorder %s24_s9, 0  ;;  %p35_p8 = scmp.eq.s32.totalorder %s4617_s21, 0 }
  0x69   : > { %p40_p9 = scmp.ne.s32.totalorder %s4609_s19, %s4605_s18  ;;  %p3849_p1 = scmp.lt.s32.totalorder %s4617_s21, 2 }
  0x6a   : > { %s4804_s23 = scalar_select %p25_p6, %s4613_s20, %s27_s8  }
  0x6b   : > { %p36_p3 = por %p35_p8, %p34_p7  ;;  %p5051_p10 = scmp.eq.s32.totalorder %s4682_s24, 0 }
  0x6c   : > { %s224_s10 = sand.u32 1, %s4613_s20   ;;  %s3411_s12 = sshll.u32 %s4617_s21, 7 }
  0x6d   : > { %p4808_p11 = por %p5051_p10, %p40_p9  ;;  %s3410_s13 = sshll.u32 %s224_s10, 3 }
  0x6e   : > { %s4817_s16 = scalar_lea.hbm %s5040_s0, %s3411_s12  ;;  %s228_s18 = scalar_lea.vmem [#allocation2], %s3410_s13 }
  0x6f   : > { %s235_s17 = sshll.u32 %s228_s18, 4  ;;  %p4819_p5 = pnand %p3849_p1, %p36_p3  ;;  %s4823_s17 = int_to_ptr.vmem [resolvable:$true] %s235_s17 }
  0x70   : > { %s225_s21 = scalar_lea.sflag [#allocation3], %s224_s10  ;;  %s4545_s26 = scalar_lea.hbm %s4817_s16, 128 }
  0x71   : > { %p4546_p12 = scmp.ne.s32.totalorder %s4817_s16, %s4545_s26  ;;  %p4547_p13 = pneg %p4819_p5 }
  0x72   : > { %s4550_s11 = scalar_lea.hbm %s5040_s0, 256  ;;  %p4551_p4 = scmp.lt.u32.totalorder %s4817_s16, %s5040_s0 }
  0x73   : > { %p4548_p0 = pnand %p4547_p13, %p4546_p12  ;;  %p4552_p7 = scmp.lt.u32.totalorder %s4550_s11, %s4545_s26 }
  0x74   : > { %p4554_p8 = scmp.lt.u32.totalorder %s4545_s26, %s4817_s16 }
  0x75   : > { %p4549_p2 = pneg %p4548_p0  ;;  %p4553_p6 = por %p4552_p7, %p4551_p4 }
  0x77   : > { %p4555_p9 = por %p4554_p8, %p4553_p6 }
  0x79   : > { %p4556_p1 = pnand %p4555_p9, %p4549_p2 }
  0x7b   : > { %4559 = shalt.err (!%p4556_p1)
}
  0x7c   : > { %s4560_s8 = scalar_lea.vmem %s4823_s17, 128  ;;  %s4629_s9 = smov [#allocation2]  }
  0x7d   : > { %p4561_p3 = scmp.ne.s32.totalorder %s4823_s17, %s4560_s8  ;;  %s4565_s10 = sshll.u32 %s4629_s9, 4  ;;  %s4566_s10 = int_to_ptr.vmem [resolvable:$false] %s4565_s10 }
  0x7e   : > { %s4567_s12 = scalar_lea.vmem %s4566_s10, 256  ;;  %p4568_p0 = scmp.lt.s32.totalorder %s4823_s17, %s4566_s10 }
  0x7f   : > { %p4563_p10 = pnand %p4561_p3, %p4547_p13  ;;  %p4569_p4 = scmp.lt.s32.totalorder %s4567_s12, %s4560_s8 }
  0x81   : > { %p4564_p12 = pneg %p4563_p10  ;;  %p4570_p7 = por %p4569_p4, %p4568_p0 }
  0x83   : > { %p4571_p6 = pnand %p4570_p7, %p4564_p12 }
  0x85   : > { %4574 = shalt.err (!%p4571_p6)
}
  0x86   : > { %3844 = dma.hbm_to_vmem [thread:$0]  (!%p4819_p5), %s4817_s16, 128, %s4823_s17, %s225_s21  }
  0x87   : > { %p5054_p2 = scmp.ne.s32.totalorder %s5048_s25, 0 }
  0x88   : > { %s246_s13 = sand.u32 (!%p5054_p2), 1, %s4609_s19  }
  0x89   : > { %244 = sbr.rel (%p5054_p2) target bundleno = 1340 (0x53c), region = 40  ;;  %s4853_s14 = sshll.u32 (!%p5054_p2), %s246_s13, 3 }
  0x8a   : > { %s247_s15 = scalar_lea.sflag (!%p5054_p2), [#allocation3], %s246_s13  ;;  %s250_s18 = scalar_lea.vmem (!%p5054_p2), [#allocation2], %s4853_s14 }
  0x90   : > { %4592 = dma.done.wait (%p4808_p11), %s247_s15, 128  }
  0x91   : > { %4594 = vsyncadd (%p4808_p11), %s247_s15, 4294967168  ;;  %p5055_p13 = scmp.eq.s32.totalorder %s4682_s24, 0 }
  0x93   : > { %4596 = dma.done.wait (%p5055_p13), [#allocation5], 4368   ;;  %p5056_p5 = pmov %p5055_p13 }
  0x95   : > { %4598 = vsyncadd (%p5056_p5), [#allocation5], 4294962928  ;;  %p5057_p8 = pmov %p5056_p5 }
  0x96   : > { %p5058_p9 = pmov %p5056_p5 }
  0x97   : > { %4600 = dma.done.wait (%p5057_p8), [#allocation8], 40960  }
  0x98   : > { %4602 = vsyncadd (%p5058_p9), [#allocation8], 4294926336  ;;  %v4630_v0 = vmov 0   ;;  %v299_v1 = vld [vmem:[#allocation6] sm:$0xff]  ;;  %v300_v3 = vld [vmem:[#allocation6 + $0x8] sm:$0xff]  ;;  %vm533_vm0 = vcmask 523264  }
  0x99   : > { %569 = vmatprep.mubr.bf16.mxu0 %v4630_v0  ;;  %610 = vmatprep.mubr.bf16.mxu1 %v4630_v0  ;;  %v303_v2 = vld [vmem:[#allocation6 + $0x20] sm:$0xff]  ;;  %v304_v5 = vld [vmem:[#allocation6 + $0x28] sm:$0xff]  ;;  %v301_v31 = vld [vmem:[#allocation6 + $0x10] sm:$0xff]  ;;  %p292_p11 = scmp.lt.s32.totalorder %s4682_s24, 1  ;;  %vm3298_vm15 = vcmask 7168  }
  0x9a   : > { %v3420_v4 = vcombine.high %v299_v1, %v303_v2  ;;  %v3419_v6 = vcombine.low %v299_v1, %v303_v2  ;;  %v307_v7 = vld [vmem:[#allocation6 + $0x40] sm:$0xff]  ;;  %v3422_v9 = vcombine.high %v300_v3, %v304_v5  ;;  %v3421_v10 = vcombine.low %v300_v3, %v304_v5  ;;  %v308_v12 = vld [vmem:[#allocation6 + $0x48] sm:$0xff]  ;;  %v305_v32 = vld [vmem:[#allocation6 + $0x30] sm:$0xff] }
  0x9b   : > { %v311_v8 = vld [vmem:[#allocation6 + $0x60] sm:$0xff]  ;;  %v312_v13 = vld [vmem:[#allocation6 + $0x68] sm:$0xff]  ;;  %v302_v33 = vld [vmem:[#allocation6 + $0x18] sm:$0xff]  ;;  %v3424_v38 = vcombine.high %v301_v31, %v305_v32  ;;  %v3423_v44 = vcombine.low %v301_v31, %v305_v32  ;;  %s5064_s24 = smov (!%p292_p11, %s4682_s24), 1 }
  0x9c   : > { %v3428_v11 = vcombine.high %v307_v7, %v311_v8  ;;  %v315_v14 = vld [vmem:[#allocation6 + $0x80] sm:$0xff]  ;;  %537 = vmatprep.subr.bf16.mxu0 %v3420_v4  ;;  %v3430_v15 = vcombine.high %v308_v12, %v312_v13  ;;  %v316_v17 = vld [vmem:[#allocation6 + $0x88] sm:$0xff]  ;;  %578 = vmatprep.subr.bf16.mxu1 %v3422_v9  ;;  %v3427_v19 = vcombine.low %v307_v7, %v311_v8  ;;  %v306_v34 = vld [vmem:[#allocation6 + $0x38] sm:$0xff]  ;;  %s3418_s25 = sshll.u32 %s5064_s24, 3 }
  0x9d   : > { %v319_v16 = vld [vmem:[#allocation6 + $0xa0] sm:$0xff]  ;;  %v320_v18 = vld [vmem:[#allocation6 + $0xa8] sm:$0xff]  ;;  %538 = vmatpush1.bf16.msra.mxu0 %v3419_v6  ;;  %579 = vmatpush1.bf16.msra.mxu1 %v3421_v10  ;;  %v3429_v20 = vcombine.low %v308_v12, %v312_v13  ;;  %v309_v39 = vld [vmem:[#allocation6 + $0x50] sm:$0xff]  ;;  %v3426_v41 = vcombine.high %v302_v33, %v306_v34  ;;  %v3425_v49 = vcombine.low %v302_v33, %v306_v34  ;;  %s295_s17 = scalar_lea.vmem %s5045_s5, %s3418_s25 }
  0x9e   : > { %539 = vmatprep.subr.bf16.mxu0 %v3428_v11  ;;  %v3436_v21 = vcombine.high %v315_v14, %v319_v16  ;;  %580 = vmatprep.subr.bf16.mxu1 %v3430_v15  ;;  %v3438_v22 = vcombine.high %v316_v17, %v320_v18  ;;  %v323_v23 = vld [vmem:[#allocation6 + $0xc0] sm:$0xff]  ;;  %v324_v25 = vld [vmem:[#allocation6 + $0xc8] sm:$0xff]  ;;  %v3435_v27 = vcombine.low %v315_v14, %v319_v16  ;;  %v313_v40 = vld [vmem:[#allocation6 + $0x70] sm:$0xff] }
  0x9f   : > { %v327_v24 = vld [vmem:[#allocation6 + $0xe0] sm:$0xff]  ;;  %v328_v26 = vld [vmem:[#allocation6 + $0xe8] sm:$0xff]  ;;  %v3437_v28 = vcombine.low %v316_v17, %v320_v18  ;;  %v310_v43 = vld [vmem:[#allocation6 + $0x58] sm:$0xff]  ;;  %v3432_v46 = vcombine.high %v309_v39, %v313_v40  ;;  %v3431_v52 = vcombine.low %v309_v39, %v313_v40 }
  0xa0   : > { %v3444_v29 = vcombine.high %v323_v23, %v327_v24  ;;  %v3446_v30 = vcombine.high %v324_v25, %v328_v26  ;;  %v3443_v35 = vcombine.low %v323_v23, %v327_v24  ;;  %v297_v36 = vld [vmem:[%s250_s18] sm:$0xff]  ;;  %v3445_v37 = vcombine.low %v324_v25, %v328_v26  ;;  %v317_v47 = vld [vmem:[#allocation6 + $0x90] sm:$0xff] }
  0xa1   : > { %540 = vmatpush1.bf16.msra.mxu0 %v3427_v19  ;;  %581 = vmatpush1.bf16.msra.mxu1 %v3429_v20  ;;  %v298_v42 = vpack.c.bf16 %v297_v36, %v297_v36  ;;  %v314_v45 = vld [vmem:[#allocation6 + $0x78] sm:$0xff]  ;;  %v321_v48 = vld [vmem:[#allocation6 + $0xb0] sm:$0xff] }
  0xa2   : > { %541 = vmatprep.subr.bf16.mxu0 %v3436_v21  ;;  %582 = vmatprep.subr.bf16.mxu1 %v3438_v22  ;;  %v3434_v50 = vcombine.high %v310_v43, %v314_v45  ;;  %v318_v51 = vld [vmem:[#allocation6 + $0x98] sm:$0xff]  ;;  %v3440_v54 = vcombine.high %v317_v47, %v321_v48  ;;  %v325_v55 = vld [vmem:[#allocation6 + $0xd0] sm:$0xff]  ;;  %v3433_v57 = vcombine.low %v310_v43, %v314_v45 }
  0xa3   : > { %v322_v53 = vld [vmem:[#allocation6 + $0xb8] sm:$0xff]  ;;  %v329_v56 = vld [vmem:[#allocation6 + $0xf0] sm:$0xff]  ;;  %v3439_v60 = vcombine.low %v317_v47, %v321_v48 }
  0xa4   : > { %v3442_v58 = vcombine.high %v318_v51, %v322_v53  ;;  %v326_v59 = vld [vmem:[#allocation6 + $0xd8] sm:$0xff]  ;;  %v3448_v62 = vcombine.high %v325_v55, %v329_v56  ;;  %v3441_v63 = vcombine.low %v318_v51, %v322_v53  ;;  %v3902_v2 = vld [vmem:[#allocation7 + $0x204] ss:$16 sps:$4 sm:$0xff]   ;;  %v3447_v3 = vcombine.low %v325_v55, %v329_v56  ;;  %v3897_v7 = vld [vmem:[#allocation7] ss:$16 sps:$4 sm:$0xff]  }
  0xa5   : > { %542 = vmatpush1.bf16.msra.mxu0 %v3435_v27  ;;  %583 = vmatpush1.bf16.msra.mxu1 %v3437_v28  ;;  %v330_v61 = vld [vmem:[#allocation6 + $0xf8] sm:$0xff]  ;;  %v3899_v4 = vld [vmem:[#allocation7 + $0x4] ss:$16 sps:$4 sm:$0xff]   ;;  %v3906_v9 = vld [vmem:[#allocation7 + $0x220] ss:$16 sps:$4 sm:$0xff]  }
  0xa6   : > { %543 = vmatprep.subr.bf16.mxu0 %v3444_v29  ;;  %584 = vmatprep.subr.bf16.mxu1 %v3446_v30  ;;  %v3450_v1 = vcombine.high %v326_v59, %v330_v61  ;;  %v3449_v5 = vcombine.low %v326_v59, %v330_v61  ;;  %v3908_v6 = vld [vmem:[#allocation7 + $0x224] ss:$16 sps:$4 sm:$0xff]   ;;  %v3903_v11 = vld [vmem:[#allocation7 + $0x20] ss:$16 sps:$4 sm:$0xff]  }
  0xa7   : > { %v3905_v8 = vld [vmem:[#allocation7 + $0x24] ss:$16 sps:$4 sm:$0xff]   ;;  %v3912_v13 = vld [vmem:[#allocation7 + $0x240] ss:$16 sps:$4 sm:$0xff]  }
  0xa8   : > { %v3914_v10 = vld [vmem:[#allocation7 + $0x244] ss:$16 sps:$4 sm:$0xff]   ;;  %v3909_v15 = vld [vmem:[#allocation7 + $0x40] ss:$16 sps:$4 sm:$0xff]  }
  0xa9   : > { %544 = vmatpush1.bf16.msra.mxu0 %v3443_v35  ;;  %585 = vmatpush1.bf16.msra.mxu1 %v3445_v37  ;;  %v3911_v12 = vld [vmem:[#allocation7 + $0x44] ss:$16 sps:$4 sm:$0xff]   ;;  %v3918_v17 = vld [vmem:[#allocation7 + $0x260] ss:$16 sps:$4 sm:$0xff]  }
  0xaa   : > { %619 = vmatprep.subr.bf16.mxu0 %v3424_v38  ;;  %660 = vmatprep.subr.bf16.mxu1 %v3426_v41  ;;  %v3920_v14 = vld [vmem:[#allocation7 + $0x264] ss:$16 sps:$4 sm:$0xff]   ;;  %v3915_v19 = vld [vmem:[#allocation7 + $0x60] ss:$16 sps:$4 sm:$0xff]  }
  0xab   : > { %v3917_v16 = vld [vmem:[#allocation7 + $0x64] ss:$16 sps:$4 sm:$0xff]   ;;  %v3924_v21 = vld [vmem:[#allocation7 + $0x280] ss:$16 sps:$4 sm:$0xff]  }
  0xac   : > { %3451 = vmatmul.mubr.msk.bf16.vlgmr.msra.gmra.mrb[0].mxu0 %vm533_vm0, %v298_v42  ;;  %3452 = vmatmul.mubr.msk.bf16.vlgmr.msra.gmra.mrb[0].mxu1 %vm533_vm0, %v298_v42  ;;  %v3926_v18 = vld [vmem:[#allocation7 + $0x284] ss:$16 sps:$4 sm:$0xff]   ;;  %v3921_v23 = vld [vmem:[#allocation7 + $0x80] ss:$16 sps:$4 sm:$0xff]  }
  0xad   : > { %620 = vmatpush1.bf16.msra.mxu0 %v3423_v44  ;;  %651 = vmatprep.mubr.bf16.mxu0 %v4630_v0  ;;  %v3923_v20 = vld [vmem:[#allocation7 + $0x84] ss:$16 sps:$4 sm:$0xff]   ;;  %v3930_v25 = vld [vmem:[#allocation7 + $0x2a0] ss:$16 sps:$4 sm:$0xff]  }
  0xae   : > { %621 = vmatprep.subr.bf16.mxu0 %v3432_v46  ;;  %661 = vmatpush1.bf16.msra.mxu1 %v3425_v49  ;;  %v3932_v22 = vld [vmem:[#allocation7 + $0x2a4] ss:$16 sps:$4 sm:$0xff]   ;;  %v3927_v26 = vld [vmem:[#allocation7 + $0xa0] ss:$16 sps:$4 sm:$0xff]  }
  0xaf   : > { %692 = vmatprep.mubr.bf16.mxu1 %v4630_v0  ;;  %662 = vmatprep.subr.bf16.mxu1 %v3434_v50  ;;  %v3900_v0 = vld [vmem:[#allocation7 + $0x200] ss:$16 sps:$4 sm:$0xff]   ;;  %v3929_v24 = vld [vmem:[#allocation7 + $0xa4] ss:$16 sps:$4 sm:$0xff]  }
  0xb0   : > { %v3935_v27 = vld [vmem:[#allocation7 + $0xc4] ss:$16 sps:$4 sm:$0xff]   ;;  %v3933_v29 = vld [vmem:[#allocation7 + $0xc0] ss:$16 sps:$4 sm:$0xff]  }
  0xb1   : > { %622 = vmatpush1.bf16.msra.mxu0 %v3431_v52  ;;  %v3938_v28 = vld [vmem:[#allocation7 + $0x2c4] ss:$16 sps:$4 sm:$0xff]   ;;  %v3936_v30 = vld [vmem:[#allocation7 + $0x2c0] ss:$16 sps:$4 sm:$0xff]  }
  0xb2   : > { %623 = vmatprep.subr.bf16.mxu0 %v3440_v54  ;;  %663 = vmatpush1.bf16.msra.mxu1 %v3433_v57  ;;  %v3941_v31 = vld [vmem:[#allocation7 + $0xe4] ss:$16 sps:$4 sm:$0xff]   ;;  %v3939_v33 = vld [vmem:[#allocation7 + $0xe0] ss:$16 sps:$4 sm:$0xff]  }
  0xb3   : > { %664 = vmatprep.subr.bf16.mxu1 %v3442_v58  ;;  %v3944_v32 = vld [vmem:[#allocation7 + $0x2e4] ss:$16 sps:$4 sm:$0xff]   ;;  %v3942_v34 = vld [vmem:[#allocation7 + $0x2e0] ss:$16 sps:$4 sm:$0xff]  }
  0xb4   : > { %v3947_v35 = vld [vmem:[#allocation7 + $0x104] ss:$16 sps:$4 sm:$0xff]   ;;  %v3945_v37 = vld [vmem:[#allocation7 + $0x100] ss:$16 sps:$4 sm:$0xff]  }
  0xb5   : > { %624 = vmatpush1.bf16.msra.mxu0 %v3439_v60  ;;  %v3950_v36 = vld [vmem:[#allocation7 + $0x304] ss:$16 sps:$4 sm:$0xff]   ;;  %v3948_v38 = vld [vmem:[#allocation7 + $0x300] ss:$16 sps:$4 sm:$0xff]  }
  0xb6   : > { %625 = vmatprep.subr.bf16.mxu0 %v3448_v62  ;;  %665 = vmatpush1.bf16.msra.mxu1 %v3441_v63  ;;  %v3953_v39 = vld [vmem:[#allocation7 + $0x124] ss:$16 sps:$4 sm:$0xff]   ;;  %v3951_v41 = vld [vmem:[#allocation7 + $0x120] ss:$16 sps:$4 sm:$0xff]  }
  0xb7   : > { %666 = vmatprep.subr.bf16.mxu1 %v3450_v1  ;;  %v3956_v40 = vld [vmem:[#allocation7 + $0x324] ss:$16 sps:$4 sm:$0xff]   ;;  %v3957_v45 = vld [vmem:[#allocation7 + $0x140] ss:$16 sps:$4 sm:$0xff]  }
  0xb8   : > { %v3959_v43 = vld [vmem:[#allocation7 + $0x144] ss:$16 sps:$4 sm:$0xff]   ;;  %v3960_v46 = vld [vmem:[#allocation7 + $0x340] ss:$16 sps:$4 sm:$0xff]  }
  0xb9   : > { %626 = vmatpush1.bf16.msra.mxu0 %v3447_v3  ;;  %v3962_v44 = vld [vmem:[#allocation7 + $0x344] ss:$16 sps:$4 sm:$0xff]   ;;  %v3963_v49 = vld [vmem:[#allocation7 + $0x160] ss:$16 sps:$4 sm:$0xff]  }
  0xba   : > { %2420 = vmatprep.subr.bf16.mxu0 %v3902_v2  ;;  %667 = vmatpush1.bf16.msra.mxu1 %v3449_v5  ;;  %v3965_v47 = vld [vmem:[#allocation7 + $0x164] ss:$16 sps:$4 sm:$0xff]   ;;  %v3966_v50 = vld [vmem:[#allocation7 + $0x360] ss:$16 sps:$4 sm:$0xff]   ;;  %v3998_v5 = vld [vmem:[#allocation7 + $0xc] ss:$16 sps:$4 sm:$0xff]  }
  0xbb   : > { %2379 = vmatprep.subr.bf16.mxu1 %v3899_v4  ;;  %v3968_v48 = vld [vmem:[#allocation7 + $0x364] ss:$16 sps:$4 sm:$0xff]   ;;  %v3969_v53 = vld [vmem:[#allocation7 + $0x180] ss:$16 sps:$4 sm:$0xff]  }
  0xbc   : > { %3453 = vmatmul.mubr.msk.bf16.vlgmr.msra.gmra.mrb[4].mxu0 %vm533_vm0, %v298_v42  ;;  %v3971_v51 = vld [vmem:[#allocation7 + $0x184] ss:$16 sps:$4 sm:$0xff]   ;;  %v3972_v54 = vld [vmem:[#allocation7 + $0x380] ss:$16 sps:$4 sm:$0xff]  }
  0xbd   : > { %2421 = vmatpush1.bf16.msra.mxu0 %v3900_v0  ;;  %3454 = vmatmul.mubr.msk.bf16.vlgmr.msra.gmra.mrb[4].mxu1 %vm533_vm0, %v298_v42  ;;  %v3954_v42 = vld [vmem:[#allocation7 + $0x320] ss:$16 sps:$4 sm:$0xff]   ;;  %v3974_v52 = vld [vmem:[#allocation7 + $0x384] ss:$16 sps:$4 sm:$0xff]   ;;  %v333_v0 = vlaneseq }
  0xbe   : > { %2422 = vmatprep.subr.bf16.mxu0 %v3908_v6  ;;  %2380 = vmatpush1.bf16.msra.mxu1 %v3897_v7  ;;  %v3977_v55 = vld [vmem:[#allocation7 + $0x1a4] ss:$16 sps:$4 sm:$0xff]   ;;  %v3975_v57 = vld [vmem:[#allocation7 + $0x1a0] ss:$16 sps:$4 sm:$0xff]  }
  0xbf   : > { %2381 = vmatprep.subr.bf16.mxu1 %v3905_v8  ;;  %v3980_v56 = vld [vmem:[#allocation7 + $0x3a4] ss:$16 sps:$4 sm:$0xff]   ;;  %v3978_v58 = vld [vmem:[#allocation7 + $0x3a0] ss:$16 sps:$4 sm:$0xff]   ;;  %v4878_v6 = vshrl.u32 %v333_v0, 7 }
  0xc0   : > { %v3983_v59 = vld [vmem:[#allocation7 + $0x1c4] ss:$16 sps:$4 sm:$0xff]   ;;  %v3981_v61 = vld [vmem:[#allocation7 + $0x1c0] ss:$16 sps:$4 sm:$0xff]  }
  0xc1   : > { %2423 = vmatpush1.bf16.msra.mxu0 %v3906_v9  ;;  %v3986_v60 = vld [vmem:[#allocation7 + $0x3c4] ss:$16 sps:$4 sm:$0xff]   ;;  %v3984_v62 = vld [vmem:[#allocation7 + $0x3c0] ss:$16 sps:$4 sm:$0xff]   ;;  %v4881_v7 = vsub.s32 0, %v4878_v6  ;;  %v343_v9 = vsub.s32 2, %v4878_v6 }
  0xc2   : > { %2424 = vmatprep.subr.bf16.mxu0 %v3914_v10  ;;  %2382 = vmatpush1.bf16.msra.mxu1 %v3903_v11  ;;  %v3989_v63 = vld [vmem:[#allocation7 + $0x1e4] ss:$16 sps:$4 sm:$0xff]   ;;  %v3987_v2 = vld [vmem:[#allocation7 + $0x1e0] ss:$16 sps:$4 sm:$0xff]   ;;  %v4887_v10 = vsub.s32 1, %v4878_v6  ;;  %v347_v11 = vsub.s32 3, %v4878_v6 }
  0xc3   : > { %2383 = vmatprep.subr.bf16.mxu1 %v3911_v12  ;;  %v3992_v1 = vld [vmem:[#allocation7 + $0x3e4] ss:$16 sps:$4 sm:$0xff]   ;;  %v3990_v3 = vld [vmem:[#allocation7 + $0x3e0] ss:$16 sps:$4 sm:$0xff]  }
  0xc4   : > { %v3995_v4 = vld [vmem:[#allocation7 + $0x404] ss:$16 sps:$4 sm:$0xff]  }
  0xc5   : > { %2425 = vmatpush1.bf16.msra.mxu0 %v3912_v13  ;;  %v4883_v8 = vld [vmem:[#allocation4] sm:$0xff] }
  0xc6   : > { %2426 = vmatprep.subr.bf16.mxu0 %v3920_v14  ;;  %2384 = vmatpush1.bf16.msra.mxu1 %v3909_v15  ;;  %v336_v12 = vrot.slane %v4883_v8, %v4881_v7  ;;  %v344_v13 = vrot.slane %v4883_v8, %v343_v9  ;;  %v340_v14 = vrot.slane %v4883_v8, %v4887_v10 }
  0xc7   : > { %2385 = vmatprep.subr.bf16.mxu1 %v3917_v16  ;;  %v348_v15 = vrot.slane %v4883_v8, %v347_v11 }
  0xc9   : > { %2427 = vmatpush1.bf16.msra.mxu0 %v3918_v17 }
  0xca   : > { %2428 = vmatprep.subr.bf16.mxu0 %v3926_v18  ;;  %2386 = vmatpush1.bf16.msra.mxu1 %v3915_v19 }
  0xcb   : > { %2387 = vmatprep.subr.bf16.mxu1 %v3923_v20 }
  0xcd   : > { %2429 = vmatpush1.bf16.msra.mxu0 %v3924_v21 }
  0xce   : > { %2430 = vmatprep.subr.bf16.mxu0 %v3932_v22  ;;  %2388 = vmatpush1.bf16.msra.mxu1 %v3921_v23 }
  0xcf   : > { %2389 = vmatprep.subr.bf16.mxu1 %v3929_v24 }
  0xd1   : > { %2431 = vmatpush1.bf16.msra.mxu0 %v3930_v25 }
  0xd2   : > { %2390 = vmatpush1.bf16.msra.mxu1 %v3927_v26  ;;  %2432 = vmatprep.subr.bf16.mxu0 %v3938_v28 }
  0xd3   : > { %2391 = vmatprep.subr.bf16.mxu1 %v3935_v27 }
  0xd5   : > { %2433 = vmatpush1.bf16.msra.mxu0 %v3936_v30 }
  0xd6   : > { %2392 = vmatpush1.bf16.msra.mxu1 %v3933_v29  ;;  %2434 = vmatprep.subr.bf16.mxu0 %v3944_v32 }
  0xd7   : > { %2393 = vmatprep.subr.bf16.mxu1 %v3941_v31 }
  0xd9   : > { %2435 = vmatpush1.bf16.msra.mxu0 %v3942_v34 }
  0xda   : > { %2394 = vmatpush1.bf16.msra.mxu1 %v3939_v33  ;;  %2436 = vmatprep.subr.bf16.mxu0 %v3950_v36  ;;  %v355_v36 = vsub.s32 5, %v4878_v6 }
  0xdb   : > { %2395 = vmatprep.subr.bf16.mxu1 %v3947_v35 }
  0xdd   : > { %2437 = vmatpush1.bf16.msra.mxu0 %v3948_v38  ;;  %v356_v38 = vrot.slane %v4883_v8, %v355_v36 }
  0xde   : > { %2396 = vmatpush1.bf16.msra.mxu1 %v3945_v37  ;;  %2438 = vmatprep.subr.bf16.mxu0 %v3956_v40 }
  0xdf   : > { %2397 = vmatprep.subr.bf16.mxu1 %v3953_v39 }
  0xe1   : > { %2439 = vmatpush1.bf16.msra.mxu0 %v3954_v42 }
  0xe2   : > { %2398 = vmatpush1.bf16.msra.mxu1 %v3951_v41  ;;  %2440 = vmatprep.subr.bf16.mxu0 %v3962_v44 }
  0xe3   : > { %2399 = vmatprep.subr.bf16.mxu1 %v3959_v43 }
  0xe5   : > { %2441 = vmatpush1.bf16.msra.mxu0 %v3960_v46 }
  0xe6   : > { %2400 = vmatpush1.bf16.msra.mxu1 %v3957_v45  ;;  %2442 = vmatprep.subr.bf16.mxu0 %v3968_v48 }
  0xe7   : > { %2401 = vmatprep.subr.bf16.mxu1 %v3965_v47 }
  0xe9   : > { %2443 = vmatpush1.bf16.msra.mxu0 %v3966_v50 }
  0xea   : > { %2402 = vmatpush1.bf16.msra.mxu1 %v3963_v49  ;;  %2444 = vmatprep.subr.bf16.mxu0 %v3974_v52 }
  0xeb   : > { %2403 = vmatprep.subr.bf16.mxu1 %v3971_v51 }
  0xed   : > { %2445 = vmatpush1.bf16.msra.mxu0 %v3972_v54 }
  0xee   : > { %2404 = vmatpush1.bf16.msra.mxu1 %v3969_v53  ;;  %2446 = vmatprep.subr.bf16.mxu0 %v3980_v56 }
  0xef   : > { %2405 = vmatprep.subr.bf16.mxu1 %v3977_v55 }
  0xf1   : > { %2447 = vmatpush1.bf16.msra.mxu0 %v3978_v58 }
  0xf2   : > { %2406 = vmatpush1.bf16.msra.mxu1 %v3975_v57  ;;  %2448 = vmatprep.subr.bf16.mxu0 %v3986_v60 }
  0xf3   : > { %2407 = vmatprep.subr.bf16.mxu1 %v3983_v59 }
  0xf5   : > { %2449 = vmatpush1.bf16.msra.mxu0 %v3984_v62 }
  0xf6   : > { %2408 = vmatpush1.bf16.msra.mxu1 %v3981_v61  ;;  %2450 = vmatprep.subr.bf16.mxu0 %v3992_v1 }
  0xf7   : > { %2409 = vmatprep.subr.bf16.mxu1 %v3989_v63 }
  0xf9   : > { %2451 = vmatpush1.bf16.msra.mxu0 %v3990_v3 }
  0xfa   : > { %2410 = vmatpush1.bf16.msra.mxu1 %v3987_v2  ;;  %2461 = vmatprep.subr.bf16.mxu0 %v3995_v4 }
  0xfb   : > { %2543 = vmatprep.subr.bf16.mxu1 %v3998_v5 }
 0x17f   : > { %v571_v16 = vpop.f32.mrb[0].mxu0  ;;  %v612_v18 = vpop.f32.mrb[0].mxu1 }
 0x180   : > { %v4900_v17 = vadd.f32 %v571_v16, %v336_v12  ;;  %v573_v19 = vpop.f32.mrb[1].mxu0  ;;  %v4902_v20 = vadd.f32 %v612_v18, %v344_v13  ;;  %v614_v22 = vpop.f32.mrb[1].mxu1 }
 0x181   : > { %v4904_v21 = vadd.f32 %v573_v19, %v340_v14  ;;  %v575_v23 = vpop.f32.mrb[2].mxu0  ;;  %v4907_v25 = vadd.f32 %v614_v22, %v348_v15  ;;  %v616_v27 = vpop.f32.mrb[2].mxu1 }
 0x182   : > { %v701_v24 = vmin.f32 %v4900_v17, 20.0  ;;  %v576_v26 = vpop.f32.mrb[3].mxu0  ;;  %v703_v28 = vmin.f32 %v4902_v20, 20.0  ;;  %v617_v30 = vpop.f32.mrb[3].mxu1  ;;  %vm791_vm1 = vcmp.gt.f32.partialorder %v4902_v20, 20.0  ;;  %vm789_vm2 = vcmp.gt.f32.partialorder %v4900_v17, 20.0 }
 0x183   : > { %v702_v29 = vmin.f32 %v4904_v21, 20.0  ;;  %v704_v32 = vmin.f32 %v4907_v25, 20.0  ;;  %vm792_vm3 = vcmp.gt.f32.partialorder %v4907_v25, 20.0  ;;  %vm790_vm4 = vcmp.gt.f32.partialorder %v4904_v21, 20.0 }
 0x184   : > { %v709_v31 = vmul.f32 1.442695, %v701_v24  ;;  %v713_v33 = vmul.f32 1.442695, %v703_v28 }
 0x185   : > { %v711_v34 = vmul.f32 1.442695, %v702_v29  ;;  %v715_v35 = vmul.f32 1.442695, %v704_v32  ;;  %v351_v32 = vsub.s32 4, %v4878_v6 }
 0x186   : > { %4377 = vpow2.f32 %v709_v31 }
 0x187   : > { %4379 = vpow2.f32 %v713_v33 }
 0x188   : > { %4381 = vpow2.f32 %v711_v34 }
 0x189   : > { %4383 = vpow2.f32 %v715_v35  ;;  %v363_v35 = vsub.s32 7, %v4878_v6 }
 0x18f   : > { %v4913_v37 = vpop.f32.mrb[4].mxu0 }
 0x190   : > { %v4378_v39 = vpop.eup %4377  ;;  %v655_v40 = vpop.f32.mrb[5].mxu0 }
 0x191   : > { %v4380_v41 = vpop.eup %4379  ;;  %v741_v42 = vmul.f32 %v4378_v39, %v4378_v39  ;;  %v749_v43 = vmul.f32 2.0, %v4378_v39  ;;  %v4916_v44 = vpop.f32.mrb[4].mxu1  ;;  %v4920_v54 = vadd.f32 %v655_v40, %v356_v38  ;;  %v725_v12 = vadd.f32 2.0, %v4378_v39 }
 0x192   : > { %v657_v45 = vpop.f32.mrb[6].mxu0  ;;  %v4382_v46 = vpop.eup %4381  ;;  %v743_v47 = vmul.f32 %v4380_v41, %v4380_v41  ;;  %v751_v48 = vmul.f32 2.0, %v4380_v41  ;;  %v727_v0 = vadd.f32 2.0, %v4380_v41 }
 0x193   : > { %v4918_v49 = vpop.f32.mrb[5].mxu1  ;;  %v658_v50 = vpop.f32.mrb[7].mxu0  ;;  %v757_v52 = vadd.f32 %v749_v43, %v741_v42  ;;  %v742_v53 = vmul.f32 %v4382_v46, %v4382_v46  ;;  %v750_v57 = vmul.f32 2.0, %v4382_v46  ;;  %v706_v2 = vmin.f32 %v4920_v54, 20.0 }
 0x194   : > { %v4384_v51 = vpop.eup %4383  ;;  %v698_v55 = vpop.f32.mrb[6].mxu1  ;;  %v759_v56 = vadd.f32 %v751_v48, %v743_v47  ;;  %v735_v14 = vmul.f32 %v4380_v41, %v727_v0  ;;  %v726_v15 = vadd.f32 2.0, %v4382_v46  ;;  %v733_v16 = vmul.f32 %v4378_v39, %v725_v12  ;;  %v3996_v48 = vld [vmem:[#allocation7 + $0x8] ss:$16 sps:$4 sm:$0xff]  }
 0x195   : > { %v765_v58 = vadd.f32 2.0, %v757_v52  ;;  %v744_v59 = vmul.f32 %v4384_v51, %v4384_v51  ;;  %v752_v60 = vmul.f32 2.0, %v4384_v51  ;;  %v699_v61 = vpop.f32.mrb[7].mxu1  ;;  %v758_v63 = vadd.f32 %v750_v57, %v742_v53  ;;  %v4004_v55 = vld [vmem:[#allocation7 + $0x2c] ss:$16 sps:$4 sm:$0xff]  }
 0x196   : > { %v767_v62 = vadd.f32 2.0, %v759_v56  ;;  %v719_v5 = vmul.f32 1.442695, %v706_v2  ;;  %v728_v13 = vadd.f32 2.0, %v4384_v51  ;;  %v734_v26 = vmul.f32 %v4382_v46, %v726_v15  ;;  %v4002_v57 = vld [vmem:[#allocation7 + $0x28] ss:$16 sps:$4 sm:$0xff]  }
 0x197   : > { %4385 = vrcp.f32 %v765_v58  ;;  %v760_v1 = vadd.f32 %v752_v60, %v744_v59  ;;  %v766_v3 = vadd.f32 2.0, %v758_v63  ;;  %v352_v43 = vrot.slane %v4883_v8, %v351_v32  ;;  %v3999_v58 = vld [vmem:[#allocation7 + $0x420] ss:$16 sps:$4 sm:$0xff]   ;;  %v4010_v59 = vld [vmem:[#allocation7 + $0x4c] ss:$16 sps:$4 sm:$0xff]  }
 0x198   : > { %4387 = vrcp.f32 %v767_v62  ;;  %v736_v23 = vmul.f32 %v4384_v51, %v728_v13  ;;  %v4007_v60 = vld [vmem:[#allocation7 + $0x444] ss:$16 sps:$4 sm:$0xff]   ;;  %v4016_v2 = vld [vmem:[#allocation7 + $0x6c] ss:$16 sps:$4 sm:$0xff]   ;;  %v4014_v0 = vld [vmem:[#allocation7 + $0x68] ss:$16 sps:$4 sm:$0xff]  }
 0x199   : > { %v768_v4 = vadd.f32 2.0, %v760_v1  ;;  %4389 = vrcp.f32 %v766_v3  ;;  %v4005_v1 = vld [vmem:[#allocation7 + $0x440] ss:$16 sps:$4 sm:$0xff]   ;;  %v4013_v3 = vld [vmem:[#allocation7 + $0x464] ss:$16 sps:$4 sm:$0xff]   ;;  %vm794_vm5 = vcmp.gt.f32.partialorder %v4920_v54, 20.0 }
 0x19a   : > { %v4022_v13 = vld [vmem:[#allocation7 + $0x8c] ss:$16 sps:$4 sm:$0xff]   ;;  %v4031_v32 = vld [vmem:[#allocation7 + $0x4c4] ss:$16 sps:$4 sm:$0xff]  }
 0x19b   : > { %4391 = vrcp.f32 %v768_v4 }
 0x19c   : > { %4393 = vpow2.f32 %v719_v5 }
 0x1a1   : > { %v4386_v18 = vpop.eup %4385 }
 0x1a2   : > { %v4388_v19 = vpop.eup %4387  ;;  %v781_v22 = vmul.f32 %v4386_v18, %v733_v16  ;;  %v4020_v18 = vld [vmem:[#allocation7 + $0x88] ss:$16 sps:$4 sm:$0xff]  }
 0x1a3   : > { %v783_v24 = vmul.f32 %v4388_v19, %v735_v14  ;;  %v4390_v27 = vpop.eup %4389  ;;  %v4019_v14 = vld [vmem:[#allocation7 + $0x484] ss:$16 sps:$4 sm:$0xff]  }
 0x1a4   : > { %v797_v28 = vmul.f32 %v781_v22, %v4900_v17  ;;  %v782_v31 = vmul.f32 %v4390_v27, %v734_v26  ;;  %v4017_v22 = vld [vmem:[#allocation7 + $0x480] ss:$16 sps:$4 sm:$0xff]   ;;  %v4026_v27 = vld [vmem:[#allocation7 + $0xa8] ss:$16 sps:$4 sm:$0xff]  }
 0x1a5   : > { %v4392_v29 = vpop.eup %4391  ;;  %v799_v30 = vmul.f32 %v783_v24, %v4902_v20  ;;  %v4025_v24 = vld [vmem:[#allocation7 + $0x4a4] ss:$16 sps:$4 sm:$0xff]  }
 0x1a6   : > { %v4394_v33 = vpop.eup %4393  ;;  %v784_v34 = vmul.f32 %v4392_v29, %v736_v23  ;;  %v798_v36 = vmul.f32 %v782_v31, %v4904_v21  ;;  %v805_v40 = vsel %vm789_vm2, %v4900_v17, %v797_v28  ;;  %v4001_v17 = vld [vmem:[#allocation7 + $0x424] ss:$16 sps:$4 sm:$0xff]   ;;  %v4028_v23 = vld [vmem:[#allocation7 + $0xac] ss:$16 sps:$4 sm:$0xff]   ;;  %v4023_v29 = vld [vmem:[#allocation7 + $0x4a0] ss:$16 sps:$4 sm:$0xff]  }
 0x1a7   : > { %v807_v38 = vsel %vm791_vm1, %v4902_v20, %v799_v30  ;;  %v746_v41 = vmul.f32 %v4394_v33, %v4394_v33  ;;  %v754_v45 = vmul.f32 2.0, %v4394_v33  ;;  %v3993_v20 = vld [vmem:[#allocation7 + $0x400] ss:$16 sps:$4 sm:$0xff]   ;;  %v4942_v52 = vpack.c.bf16 %v805_v40, %v805_v40  ;;  %v4034_v30 = vld [vmem:[#allocation7 + $0xcc] ss:$16 sps:$4 sm:$0xff]  }
 0x1a8   : > { %v800_v39 = vmul.f32 %v784_v34, %v4907_v25  ;;  %v806_v42 = vsel %vm790_vm4, %v4904_v21, %v798_v36  ;;  %v4938_v50 = vpack.c.bf16 %v807_v38, %v807_v38  ;;  %v364_v21 = vrot.slane %v4883_v8, %v363_v35  ;;  %v4029_v35 = vld [vmem:[#allocation7 + $0x4c0] ss:$16 sps:$4 sm:$0xff]   ;;  %v4040_v36 = vld [vmem:[#allocation7 + $0xec] ss:$16 sps:$4 sm:$0xff]   ;;  %v4037_v38 = vld [vmem:[#allocation7 + $0x4e4] ss:$16 sps:$4 sm:$0xff]  }
 0x1a9   : > { %v814_v46 = vpack.c.bf16 %v806_v42, %v806_v42  ;;  %v762_v53 = vadd.f32 %v754_v45, %v746_v41  ;;  %v730_v63 = vadd.f32 2.0, %v4394_v33  ;;  %v4038_v41 = vld [vmem:[#allocation7 + $0xe8] ss:$16 sps:$4 sm:$0xff]   ;;  %v4035_v42 = vld [vmem:[#allocation7 + $0x4e0] ss:$16 sps:$4 sm:$0xff]  }
 0x1aa   : > { %v808_v47 = vsel %vm792_vm3, %v4907_v25, %v800_v39  ;;  %v4948_v25 = vadd.f32 %v4913_v37, %v352_v43  ;;  %v4952_v61 = vadd.f32 %v4918_v49, %v364_v21  ;;  %v4008_v37 = vld [vmem:[#allocation7 + $0x48] ss:$16 sps:$4 sm:$0xff]   ;;  %v4011_v49 = vld [vmem:[#allocation7 + $0x460] ss:$16 sps:$4 sm:$0xff]   ;;  %v4046_v43 = vld [vmem:[#allocation7 + $0x10c] ss:$16 sps:$4 sm:$0xff]  }
 0x1ab   : > { %v4940_v51 = vpack.c.bf16 %v808_v47, %v808_v47  ;;  %2411 = vmatprep.mubr.bf16.mxu1 %v814_v46  ;;  %v770_v56 = vadd.f32 2.0, %v762_v53  ;;  %v738_v12 = vmul.f32 %v4394_v33, %v730_v63  ;;  %v4032_v33 = vld [vmem:[#allocation7 + $0xc8] ss:$16 sps:$4 sm:$0xff]   ;;  %v4043_v45 = vld [vmem:[#allocation7 + $0x504] ss:$16 sps:$4 sm:$0xff]  }
 0x1ac   : > { %2412 = vmatmul.mubr.bf16.vlgmr.msra.gmra.mrb[8].mxu1 %v4942_v52  ;;  %v705_v62 = vmin.f32 %v4948_v25, 20.0  ;;  %v708_v4 = vmin.f32 %v4952_v61, 20.0  ;;  %v4041_v53 = vld [vmem:[#allocation7 + $0x500] ss:$16 sps:$4 sm:$0xff]   ;;  %vm793_vm6 = vcmp.gt.f32.partialorder %v4948_v25, 20.0  ;;  %vm796_vm7 = vcmp.gt.f32.partialorder %v4952_v61, 20.0 }
 0x1ad   : > { %2452 = vmatprep.mubr.bf16.mxu0 %v4940_v51  ;;  %2544 = vmatpush1.bf16.msra.mxu1 %v3996_v48  ;;  %4395 = vrcp.f32 %v770_v56  ;;  %v4053_v63 = vld [vmem:[#allocation7 + $0x540] ss:$16 sps:$4 sm:$0xff]  }
 0x1ae   : > { %2453 = vmatmul.mubr.bf16.vlgmr.msra.gmra.mrb[8].mxu0 %v4938_v50  ;;  %2575 = vmatprep.mubr.bf16.mxu1 %v814_v46  ;;  %v717_v5 = vmul.f32 1.442695, %v705_v62  ;;  %v723_v15 = vmul.f32 1.442695, %v708_v4 }
 0x1af   : > { %2462 = vmatpush1.bf16.msra.mxu0 %v3993_v20  ;;  %2545 = vmatprep.subr.bf16.mxu1 %v4004_v55  ;;  %v4044_v20 = vld [vmem:[#allocation7 + $0x108] ss:$16 sps:$4 sm:$0xff]   ;;  %v4049_v55 = vld [vmem:[#allocation7 + $0x524] ss:$16 sps:$4 sm:$0xff]  }
 0x1b0   : > { %2463 = vmatprep.subr.bf16.mxu0 %v4001_v17  ;;  %4397 = vpow2.f32 %v717_v5  ;;  %v4052_v17 = vld [vmem:[#allocation7 + $0x12c] ss:$16 sps:$4 sm:$0xff]   ;;  %v4059_v5 = vld [vmem:[#allocation7 + $0x560] ss:$16 sps:$4 sm:$0xff]  }
 0x1b1   : > { %2546 = vmatpush1.bf16.msra.mxu1 %v4002_v57  ;;  %4399 = vpow2.f32 %v723_v15  ;;  %v4050_v57 = vld [vmem:[#allocation7 + $0x128] ss:$16 sps:$4 sm:$0xff]   ;;  %v4065_v15 = vld [vmem:[#allocation7 + $0x580] ss:$16 sps:$4 sm:$0xff]  }
 0x1b2   : > { %2547 = vmatprep.subr.bf16.mxu1 %v4010_v59  ;;  %v4058_v59 = vld [vmem:[#allocation7 + $0x14c] ss:$16 sps:$4 sm:$0xff]  }
 0x1b3   : > { %2464 = vmatpush1.bf16.msra.mxu0 %v3999_v58  ;;  %v4047_v58 = vld [vmem:[#allocation7 + $0x520] ss:$16 sps:$4 sm:$0xff]  }
 0x1b4   : > { %2465 = vmatprep.subr.bf16.mxu0 %v4007_v60  ;;  %v4055_v60 = vld [vmem:[#allocation7 + $0x544] ss:$16 sps:$4 sm:$0xff]  }
 0x1b5   : > { %2548 = vmatpush1.bf16.msra.mxu1 %v4008_v37  ;;  %v4056_v37 = vld [vmem:[#allocation7 + $0x148] ss:$16 sps:$4 sm:$0xff]  }
 0x1b6   : > { %2549 = vmatprep.subr.bf16.mxu1 %v4016_v2  ;;  %v4061_v2 = vld [vmem:[#allocation7 + $0x564] ss:$16 sps:$4 sm:$0xff]  }
 0x1b7   : > { %2466 = vmatpush1.bf16.msra.mxu0 %v4005_v1  ;;  %v4396_v16 = vpop.eup %4395  ;;  %v4064_v1 = vld [vmem:[#allocation7 + $0x16c] ss:$16 sps:$4 sm:$0xff]  }
 0x1b8   : > { %2467 = vmatprep.subr.bf16.mxu0 %v4013_v3  ;;  %v786_v19 = vmul.f32 %v4396_v16, %v738_v12  ;;  %v4062_v3 = vld [vmem:[#allocation7 + $0x168] ss:$16 sps:$4 sm:$0xff]   ;;  %v4067_v12 = vld [vmem:[#allocation7 + $0x584] ss:$16 sps:$4 sm:$0xff]   ;;  %v4076_v16 = vld [vmem:[#allocation7 + $0x1ac] ss:$16 sps:$4 sm:$0xff]  }
 0x1b9   : > { %2550 = vmatpush1.bf16.msra.mxu1 %v4014_v0  ;;  %v4070_v0 = vld [vmem:[#allocation7 + $0x18c] ss:$16 sps:$4 sm:$0xff]  }
 0x1ba   : > { %2551 = vmatprep.subr.bf16.mxu1 %v4022_v13  ;;  %v802_v26 = vmul.f32 %v786_v19, %v4920_v54  ;;  %v4398_v34 = vpop.eup %4397  ;;  %v4073_v19 = vld [vmem:[#allocation7 + $0x5a4] ss:$16 sps:$4 sm:$0xff]  }
 0x1bb   : > { %2468 = vmatpush1.bf16.msra.mxu0 %v4011_v49  ;;  %v745_v39 = vmul.f32 %v4398_v34, %v4398_v34  ;;  %v753_v40 = vmul.f32 2.0, %v4398_v34  ;;  %v729_v4 = vadd.f32 2.0, %v4398_v34  ;;  %v4068_v49 = vld [vmem:[#allocation7 + $0x188] ss:$16 sps:$4 sm:$0xff]  }
 0x1bc   : > { %2469 = vmatprep.subr.bf16.mxu0 %v4019_v14  ;;  %v810_v28 = vsel %vm794_vm5, %v4920_v54, %v802_v26  ;;  %v4962_v54 = vpop.eup %4399 }
 0x1bd   : > { %2552 = vmatpush1.bf16.msra.mxu1 %v4020_v18  ;;  %v4959_v31 = vpack.c.bf16 %v810_v28, %v810_v28  ;;  %v748_v46 = vmul.f32 %v4962_v54, %v4962_v54  ;;  %v756_v47 = vmul.f32 2.0, %v4962_v54  ;;  %v761_v48 = vadd.f32 %v753_v40, %v745_v39  ;;  %v4082_v28 = vld [vmem:[#allocation7 + $0x1cc] ss:$16 sps:$4 sm:$0xff]   ;;  %v4083_v40 = vld [vmem:[#allocation7 + $0x5e0] ss:$16 sps:$4 sm:$0xff]  }
 0x1be   : > { %2553 = vmatprep.subr.bf16.mxu1 %v4028_v23  ;;  %v732_v13 = vadd.f32 2.0, %v4962_v54  ;;  %v737_v14 = vmul.f32 %v4398_v34, %v729_v4  ;;  %v4077_v34 = vld [vmem:[#allocation7 + $0x5c0] ss:$16 sps:$4 sm:$0xff]   ;;  %v4121_v4 = vld [vmem:[#allocation7 + $0x6a4] ss:$16 sps:$4 sm:$0xff]  }
 0x1bf   : > { %2470 = vmatpush1.bf16.msra.mxu0 %v4017_v22  ;;  %2493 = vmatprep.mubr.bf16.mxu0 %v4959_v31  ;;  %v764_v21 = vadd.f32 %v756_v47, %v748_v46  ;;  %v769_v56 = vadd.f32 2.0, %v761_v48  ;;  %v4074_v22 = vld [vmem:[#allocation7 + $0x1a8] ss:$16 sps:$4 sm:$0xff]  }
 0x1c0   : > { %2471 = vmatprep.subr.bf16.mxu0 %v4025_v24  ;;  %v740_v23 = vmul.f32 %v4962_v54, %v732_v13  ;;  %v4086_v54 = vld [vmem:[#allocation7 + $0x1e8] ss:$16 sps:$4 sm:$0xff]  }
 0x1c1   : > { %2554 = vmatpush1.bf16.msra.mxu1 %v4026_v27  ;;  %v772_v62 = vadd.f32 2.0, %v764_v21  ;;  %4401 = vrcp.f32 %v769_v56  ;;  %v4071_v27 = vld [vmem:[#allocation7 + $0x5a0] ss:$16 sps:$4 sm:$0xff]   ;;  %v4092_v46 = vld [vmem:[#allocation7 + $0x208] ss:$16 sps:$4 sm:$0xff]  }
 0x1c2   : > { %2555 = vmatprep.subr.bf16.mxu1 %v4034_v30  ;;  %v4080_v30 = vld [vmem:[#allocation7 + $0x1c8] ss:$16 sps:$4 sm:$0xff]   ;;  %v4106_v21 = vld [vmem:[#allocation7 + $0x24c] ss:$16 sps:$4 sm:$0xff]   ;;  %v4103_v56 = vld [vmem:[#allocation7 + $0x644] ss:$16 sps:$4 sm:$0xff]  }
 0x1c3   : > { %2472 = vmatpush1.bf16.msra.mxu0 %v4023_v29  ;;  %4403 = vrcp.f32 %v772_v62  ;;  %v4079_v29 = vld [vmem:[#allocation7 + $0x5c4] ss:$16 sps:$4 sm:$0xff]   ;;  %v4107_v62 = vld [vmem:[#allocation7 + $0x660] ss:$16 sps:$4 sm:$0xff]   ;;  %v4128_v13 = vld [vmem:[#allocation7 + $0x2c8] ss:$16 sps:$4 sm:$0xff]  }
 0x1c4   : > { %2473 = vmatprep.subr.bf16.mxu0 %v4031_v32 }
 0x1c5   : > { %2556 = vmatpush1.bf16.msra.mxu1 %v4032_v33 }
 0x1c6   : > { %2557 = vmatprep.subr.bf16.mxu1 %v4040_v36  ;;  %v4085_v36 = vld [vmem:[#allocation7 + $0x5e4] ss:$16 sps:$4 sm:$0xff]  }
 0x1c7   : > { %2474 = vmatpush1.bf16.msra.mxu0 %v4029_v35  ;;  %v4088_v35 = vld [vmem:[#allocation7 + $0x1ec] ss:$16 sps:$4 sm:$0xff]  }
 0x1c8   : > { %2475 = vmatprep.subr.bf16.mxu0 %v4037_v38  ;;  %v359_v38 = vsub.s32 6, %v4878_v6 }
 0x1c9   : > { %2558 = vmatpush1.bf16.msra.mxu1 %v4038_v41  ;;  %v4094_v41 = vld [vmem:[#allocation7 + $0x20c] ss:$16 sps:$4 sm:$0xff]  }
 0x1ca   : > { %2559 = vmatprep.subr.bf16.mxu1 %v4046_v43  ;;  %v4091_v43 = vld [vmem:[#allocation7 + $0x604] ss:$16 sps:$4 sm:$0xff]  }
 0x1cb   : > { %2476 = vmatpush1.bf16.msra.mxu0 %v4035_v42  ;;  %v4402_v18 = vpop.eup %4401 }
 0x1cc   : > { %2477 = vmatprep.subr.bf16.mxu0 %v4043_v45  ;;  %v785_v26 = vmul.f32 %v4402_v18, %v737_v14  ;;  %v360_v45 = vrot.slane %v4883_v8, %v359_v38  ;;  %v4098_v8 = vld [vmem:[#allocation7 + $0x228] ss:$16 sps:$4 sm:$0xff]   ;;  %v4133_v18 = vld [vmem:[#allocation7 + $0x6e4] ss:$16 sps:$4 sm:$0xff]   ;;  %v4154_v38 = vld [vmem:[#allocation7 + $0x34c] ss:$16 sps:$4 sm:$0xff]  }
 0x1cd   : > { %2560 = vmatpush1.bf16.msra.mxu1 %v4044_v20  ;;  %v4404_v24 = vpop.eup %4403  ;;  %v4089_v20 = vld [vmem:[#allocation7 + $0x600] ss:$16 sps:$4 sm:$0xff]  }
 0x1ce   : > { %2561 = vmatprep.subr.bf16.mxu1 %v4052_v17  ;;  %v788_v32 = vmul.f32 %v4404_v24, %v740_v23  ;;  %v801_v33 = vmul.f32 %v785_v26, %v4948_v25  ;;  %v4100_v17 = vld [vmem:[#allocation7 + $0x22c] ss:$16 sps:$4 sm:$0xff]   ;;  %v4134_v23 = vld [vmem:[#allocation7 + $0x2e8] ss:$16 sps:$4 sm:$0xff]   ;;  %v4131_v24 = vld [vmem:[#allocation7 + $0x6e0] ss:$16 sps:$4 sm:$0xff]  }
 0x1cf   : > { %2478 = vmatpush1.bf16.msra.mxu0 %v4041_v53  ;;  %v4097_v53 = vld [vmem:[#allocation7 + $0x624] ss:$16 sps:$4 sm:$0xff]   ;;  %v4142_v26 = vld [vmem:[#allocation7 + $0x30c] ss:$16 sps:$4 sm:$0xff]  }
 0x1d0   : > { %2479 = vmatprep.subr.bf16.mxu0 %v4049_v55  ;;  %v804_v39 = vmul.f32 %v788_v32, %v4952_v61  ;;  %v809_v42 = vsel %vm793_vm6, %v4948_v25, %v801_v33  ;;  %v4981_v25 = vadd.f32 %v4916_v44, %v360_v45  ;;  %v4104_v44 = vld [vmem:[#allocation7 + $0x248] ss:$16 sps:$4 sm:$0xff]   ;;  %v4148_v32 = vld [vmem:[#allocation7 + $0x32c] ss:$16 sps:$4 sm:$0xff]   ;;  %v4145_v33 = vld [vmem:[#allocation7 + $0x724] ss:$16 sps:$4 sm:$0xff]  }
 0x1d1   : > { %2562 = vmatpush1.bf16.msra.mxu1 %v4050_v57  ;;  %v4976_v47 = vpack.c.bf16 %v809_v42, %v809_v42  ;;  %v4157_v42 = vld [vmem:[#allocation7 + $0x764] ss:$16 sps:$4 sm:$0xff]  }
 0x1d2   : > { %2563 = vmatprep.subr.bf16.mxu1 %v4058_v59  ;;  %v812_v48 = vsel %vm796_vm7, %v4952_v61, %v804_v39  ;;  %v4095_v61 = vld [vmem:[#allocation7 + $0x620] ss:$16 sps:$4 sm:$0xff]   ;;  %v707_v57 = vmin.f32 %v4981_v25, 20.0  ;;  %v4109_v59 = vld [vmem:[#allocation7 + $0x664] ss:$16 sps:$4 sm:$0xff]   ;;  %vm795_vm8 = vcmp.gt.f32.partialorder %v4981_v25, 20.0 }
 0x1d3   : > { %2480 = vmatpush1.bf16.msra.mxu0 %v4047_v58  ;;  %v4983_v55 = vpack.c.bf16 %v812_v48, %v812_v48  ;;  %v4112_v58 = vld [vmem:[#allocation7 + $0x26c] ss:$16 sps:$4 sm:$0xff]   ;;  %v4152_v39 = vld [vmem:[#allocation7 + $0x348] ss:$16 sps:$4 sm:$0xff]  }
 0x1d4   : > { %2481 = vmatprep.subr.bf16.mxu0 %v4055_v60  ;;  %v721_v60 = vmul.f32 1.442695, %v707_v57  ;;  %v4166_v48 = vld [vmem:[#allocation7 + $0x38c] ss:$16 sps:$4 sm:$0xff]   ;;  %v4170_v57 = vld [vmem:[#allocation7 + $0x3a8] ss:$16 sps:$4 sm:$0xff]  }
 0x1d5   : > { %2564 = vmatpush1.bf16.msra.mxu1 %v4056_v37  ;;  %v4118_v37 = vld [vmem:[#allocation7 + $0x28c] ss:$16 sps:$4 sm:$0xff]  }
 0x1d6   : > { %2565 = vmatprep.subr.bf16.mxu1 %v4064_v1  ;;  %4405 = vpow2.f32 %v721_v60  ;;  %v4116_v1 = vld [vmem:[#allocation7 + $0x288] ss:$16 sps:$4 sm:$0xff]  }
 0x1d7   : > { %2482 = vmatpush1.bf16.msra.mxu0 %v4053_v63  ;;  %v4115_v63 = vld [vmem:[#allocation7 + $0x684] ss:$16 sps:$4 sm:$0xff]   ;;  %v4176_v60 = vld [vmem:[#allocation7 + $0x3c8] ss:$16 sps:$4 sm:$0xff]  }
 0x1d8   : > { %2483 = vmatprep.subr.bf16.mxu0 %v4061_v2  ;;  %v4113_v2 = vld [vmem:[#allocation7 + $0x680] ss:$16 sps:$4 sm:$0xff]  }
 0x1d9   : > { %2566 = vmatpush1.bf16.msra.mxu1 %v4062_v3  ;;  %v4124_v3 = vld [vmem:[#allocation7 + $0x2ac] ss:$16 sps:$4 sm:$0xff]  }
 0x1da   : > { %2567 = vmatprep.subr.bf16.mxu1 %v4070_v0  ;;  %v4119_v0 = vld [vmem:[#allocation7 + $0x6a0] ss:$16 sps:$4 sm:$0xff]  }
 0x1db   : > { %2484 = vmatpush1.bf16.msra.mxu0 %v4059_v5  ;;  %v4122_v5 = vld [vmem:[#allocation7 + $0x2a8] ss:$16 sps:$4 sm:$0xff]  }
 0x1dc   : > { %2485 = vmatprep.subr.bf16.mxu0 %v4067_v12  ;;  %v4130_v12 = vld [vmem:[#allocation7 + $0x2cc] ss:$16 sps:$4 sm:$0xff]  }
 0x1dd   : > { %2568 = vmatpush1.bf16.msra.mxu1 %v4068_v49  ;;  %v4127_v49 = vld [vmem:[#allocation7 + $0x6c4] ss:$16 sps:$4 sm:$0xff]  }
 0x1de   : > { %2569 = vmatprep.subr.bf16.mxu1 %v4076_v16  ;;  %v4136_v16 = vld [vmem:[#allocation7 + $0x2ec] ss:$16 sps:$4 sm:$0xff]  }
 0x1df   : > { %2486 = vmatpush1.bf16.msra.mxu0 %v4065_v15  ;;  %v4125_v15 = vld [vmem:[#allocation7 + $0x6c0] ss:$16 sps:$4 sm:$0xff]  }
 0x1e0   : > { %2487 = vmatprep.subr.bf16.mxu0 %v4073_v19  ;;  %v4406_v14 = vpop.eup %4405 }
 0x1e1   : > { %2570 = vmatpush1.bf16.msra.mxu1 %v4074_v22  ;;  %v747_v19 = vmul.f32 %v4406_v14, %v4406_v14  ;;  %v755_v22 = vmul.f32 2.0, %v4406_v14  ;;  %v731_v45 = vadd.f32 2.0, %v4406_v14 }
 0x1e2   : > { %2571 = vmatprep.subr.bf16.mxu1 %v4082_v28 }
 0x1e3   : > { %2488 = vmatpush1.bf16.msra.mxu0 %v4071_v27  ;;  %v4139_v27 = vld [vmem:[#allocation7 + $0x704] ss:$16 sps:$4 sm:$0xff]   ;;  %v763_v28 = vadd.f32 %v755_v22, %v747_v19  ;;  %v4287_v22 = vld [vmem:[#allocation9 + $0x20] ss:$8 sps:$4 sm:$0xff]  }
 0x1e4   : > { %2489 = vmatprep.subr.bf16.mxu0 %v4079_v29  ;;  %v4140_v29 = vld [vmem:[#allocation7 + $0x308] ss:$16 sps:$4 sm:$0xff]   ;;  %v4289_v19 = vld [vmem:[#allocation9 + $0x24] ss:$8 sps:$4 sm:$0xff]  }
 0x1e5   : > { %2572 = vmatpush1.bf16.msra.mxu1 %v4080_v30  ;;  %v4137_v30 = vld [vmem:[#allocation7 + $0x700] ss:$16 sps:$4 sm:$0xff]  }
 0x1e6   : > { %2573 = vmatprep.subr.bf16.mxu1 %v4088_v35  ;;  %v4146_v35 = vld [vmem:[#allocation7 + $0x328] ss:$16 sps:$4 sm:$0xff]  }
 0x1e7   : > { %2490 = vmatpush1.bf16.msra.mxu0 %v4077_v34  ;;  %v771_v34 = vadd.f32 2.0, %v763_v28  ;;  %v4295_v28 = vld [vmem:[#allocation9 + $0x44] ss:$8 sps:$4 sm:$0xff]  }
 0x1e8   : > { %2491 = vmatprep.subr.bf16.mxu0 %v4085_v36  ;;  %v4143_v36 = vld [vmem:[#allocation7 + $0x720] ss:$16 sps:$4 sm:$0xff]  }
 0x1e9   : > { %2574 = vmatpush1.bf16.msra.mxu1 %v4086_v54  ;;  %v4151_v54 = vld [vmem:[#allocation7 + $0x744] ss:$16 sps:$4 sm:$0xff]   ;;  %4407 = vrcp.f32 %v771_v34  ;;  %v4203_v34 = vld [vmem:[#allocation7 + $0x4c8] ss:$16 sps:$4 sm:$0xff]  }
 0x1ea   : > { %2584 = vmatprep.subr.bf16.mxu1 %v4094_v41  ;;  %v4160_v41 = vld [vmem:[#allocation7 + $0x36c] ss:$16 sps:$4 sm:$0xff]  }
 0x1eb   : > { %2492 = vmatpush1.bf16.msra.mxu0 %v4083_v40  ;;  %v4149_v40 = vld [vmem:[#allocation7 + $0x740] ss:$16 sps:$4 sm:$0xff]  }
 0x1ec   : > { %2502 = vmatprep.subr.bf16.mxu0 %v4091_v43  ;;  %2576 = vmatmul.mubr.bf16.vlgmr.msra.gmra.mrb[12].mxu1 %v4942_v52  ;;  %v4101_v52 = vld [vmem:[#allocation7 + $0x640] ss:$16 sps:$4 sm:$0xff]   ;;  %v4158_v43 = vld [vmem:[#allocation7 + $0x368] ss:$16 sps:$4 sm:$0xff]  }
 0x1ed   : > { %2585 = vmatpush1.bf16.msra.mxu1 %v4092_v46  ;;  %2616 = vmatprep.mubr.bf16.mxu1 %v4940_v51  ;;  %v4110_v51 = vld [vmem:[#allocation7 + $0x268] ss:$16 sps:$4 sm:$0xff]   ;;  %v4155_v46 = vld [vmem:[#allocation7 + $0x760] ss:$16 sps:$4 sm:$0xff]  }
 0x1ee   : > { %2494 = vmatmul.mubr.bf16.vlgmr.msra.gmra.mrb[8].mxu0 %v4976_v47  ;;  %2586 = vmatprep.subr.bf16.mxu1 %v4100_v17  ;;  %v739_v17 = vmul.f32 %v4406_v14, %v731_v45  ;;  %v4188_v14 = vld [vmem:[#allocation7 + $0x428] ss:$16 sps:$4 sm:$0xff]  }
 0x1ef   : > { %2503 = vmatpush1.bf16.msra.mxu0 %v4089_v20  ;;  %2534 = vmatprep.mubr.bf16.mxu0 %v4983_v55  ;;  %v4163_v20 = vld [vmem:[#allocation7 + $0x784] ss:$16 sps:$4 sm:$0xff]   ;;  %v4218_v45 = vld [vmem:[#allocation7 + $0x568] ss:$16 sps:$4 sm:$0xff]  }
 0x1f0   : > { %2504 = vmatprep.subr.bf16.mxu0 %v4097_v53  ;;  %v4164_v53 = vld [vmem:[#allocation7 + $0x388] ss:$16 sps:$4 sm:$0xff]  }
 0x1f1   : > { %2587 = vmatpush1.bf16.msra.mxu1 %v4098_v8  ;;  %v4161_v8 = vld [vmem:[#allocation7 + $0x780] ss:$16 sps:$4 sm:$0xff]  }
 0x1f2   : > { %2588 = vmatprep.subr.bf16.mxu1 %v4106_v21 }
 0x1f3   : > { %2505 = vmatpush1.bf16.msra.mxu0 %v4095_v61  ;;  %v4172_v61 = vld [vmem:[#allocation7 + $0x3ac] ss:$16 sps:$4 sm:$0xff]   ;;  %v4408_v21 = vpop.eup %4407 }
 0x1f4   : > { %2506 = vmatprep.subr.bf16.mxu0 %v4103_v56  ;;  %v4169_v56 = vld [vmem:[#allocation7 + $0x7a4] ss:$16 sps:$4 sm:$0xff]  }
 0x1f5   : > { %2589 = vmatpush1.bf16.msra.mxu1 %v4104_v44  ;;  %v787_v44 = vmul.f32 %v4408_v21, %v739_v17  ;;  %v4229_v17 = vld [vmem:[#allocation7 + $0x5cc] ss:$16 sps:$4 sm:$0xff]   ;;  %v4230_v21 = vld [vmem:[#allocation7 + $0x5e8] ss:$16 sps:$4 sm:$0xff]  }
 0x1f6   : > { %2590 = vmatprep.subr.bf16.mxu1 %v4112_v58  ;;  %v4178_v58 = vld [vmem:[#allocation7 + $0x3cc] ss:$16 sps:$4 sm:$0xff]  }
 0x1f7   : > { %2507 = vmatpush1.bf16.msra.mxu0 %v4101_v52  ;;  %v4167_v52 = vld [vmem:[#allocation7 + $0x7a0] ss:$16 sps:$4 sm:$0xff]  }
 0x1f8   : > { %2508 = vmatprep.subr.bf16.mxu0 %v4109_v59  ;;  %v4175_v59 = vld [vmem:[#allocation7 + $0x7c4] ss:$16 sps:$4 sm:$0xff]  }
 0x1f9   : > { %2591 = vmatpush1.bf16.msra.mxu1 %v4110_v51  ;;  %v803_v51 = vmul.f32 %v787_v44, %v4981_v25  ;;  %v4238_v44 = vld [vmem:[#allocation7 + $0x62c] ss:$16 sps:$4 sm:$0xff]  }
 0x1fa   : > { %2592 = vmatprep.subr.bf16.mxu1 %v4118_v37  ;;  %v4184_v37 = vld [vmem:[#allocation7 + $0x3ec] ss:$16 sps:$4 sm:$0xff]  }
 0x1fb   : > { %2509 = vmatpush1.bf16.msra.mxu0 %v4107_v62  ;;  %v4173_v62 = vld [vmem:[#allocation7 + $0x7c0] ss:$16 sps:$4 sm:$0xff]  }
 0x1fc   : > { %2510 = vmatprep.subr.bf16.mxu0 %v4115_v63  ;;  %v4181_v63 = vld [vmem:[#allocation7 + $0x7e4] ss:$16 sps:$4 sm:$0xff]  }
 0x1fd   : > { %2593 = vmatpush1.bf16.msra.mxu1 %v4116_v1  ;;  %v4182_v1 = vld [vmem:[#allocation7 + $0x3e8] ss:$16 sps:$4 sm:$0xff]  }
 0x1fe   : > { %2594 = vmatprep.subr.bf16.mxu1 %v4124_v3  ;;  %v811_v3 = vsel %vm795_vm8, %v4981_v25, %v803_v51  ;;  %v4193_v25 = vld [vmem:[#allocation7 + $0x44c] ss:$16 sps:$4 sm:$0xff]   ;;  %v4242_v51 = vld [vmem:[#allocation7 + $0x668] ss:$16 sps:$4 sm:$0xff]  }
 0x1ff   : > { %2511 = vmatpush1.bf16.msra.mxu0 %v4113_v2  ;;  %v4179_v2 = vld [vmem:[#allocation7 + $0x7e0] ss:$16 sps:$4 sm:$0xff]  }
 0x200   : > { %2512 = vmatprep.subr.bf16.mxu0 %v4121_v4  ;;  %v4187_v4 = vld [vmem:[#allocation7 + $0x40c] ss:$16 sps:$4 sm:$0xff]  }
 0x201   : > { %2595 = vmatpush1.bf16.msra.mxu1 %v4122_v5  ;;  %v4992_v5 = vpack.c.bf16 %v811_v3, %v811_v3  ;;  %v4296_v3 = vld [vmem:[#allocation9 + $0x50] ss:$8 sps:$4 sm:$0xff]  }
 0x202   : > { %2596 = vmatprep.subr.bf16.mxu1 %v4130_v12  ;;  %v4190_v12 = vld [vmem:[#allocation7 + $0x42c] ss:$16 sps:$4 sm:$0xff]  }
 0x203   : > { %2513 = vmatpush1.bf16.msra.mxu0 %v4119_v0  ;;  %v4185_v0 = vld [vmem:[#allocation7 + $0x408] ss:$16 sps:$4 sm:$0xff]  }
 0x204   : > { %2514 = vmatprep.subr.bf16.mxu0 %v4127_v49  ;;  %v4281_v49 = vld [vmem:[#allocation9] ss:$8 sps:$4 sm:$0xff]  }
 0x205   : > { %2597 = vmatpush1.bf16.msra.mxu1 %v4128_v13  ;;  %v4283_v13 = vld [vmem:[#allocation9 + $0x4] ss:$8 sps:$4 sm:$0xff]  }
 0x206   : > { %2598 = vmatprep.subr.bf16.mxu1 %v4136_v16  ;;  %v4284_v16 = vld [vmem:[#allocation9 + $0x10] ss:$8 sps:$4 sm:$0xff]  }
 0x207   : > { %2515 = vmatpush1.bf16.msra.mxu0 %v4125_v15  ;;  %v4286_v15 = vld [vmem:[#allocation9 + $0x14] ss:$8 sps:$4 sm:$0xff]  }
 0x208   : > { %2516 = vmatprep.subr.bf16.mxu0 %v4133_v18  ;;  %v4191_v18 = vld [vmem:[#allocation7 + $0x448] ss:$16 sps:$4 sm:$0xff]  }
 0x209   : > { %2599 = vmatpush1.bf16.msra.mxu1 %v4134_v23  ;;  %v4194_v23 = vld [vmem:[#allocation7 + $0x468] ss:$16 sps:$4 sm:$0xff]  }
 0x20a   : > { %2600 = vmatprep.subr.bf16.mxu1 %v4142_v26  ;;  %v4199_v26 = vld [vmem:[#allocation7 + $0x48c] ss:$16 sps:$4 sm:$0xff]  }
 0x20b   : > { %2517 = vmatpush1.bf16.msra.mxu0 %v4131_v24  ;;  %v4292_v24 = vld [vmem:[#allocation9 + $0x34] ss:$8 sps:$4 sm:$0xff]  }
 0x20c   : > { %2518 = vmatprep.subr.bf16.mxu0 %v4139_v27  ;;  %v4197_v27 = vld [vmem:[#allocation7 + $0x488] ss:$16 sps:$4 sm:$0xff]  }
 0x20d   : > { %2601 = vmatpush1.bf16.msra.mxu1 %v4140_v29  ;;  %v4202_v29 = vld [vmem:[#allocation7 + $0x4ac] ss:$16 sps:$4 sm:$0xff]  }
 0x20e   : > { %2602 = vmatprep.subr.bf16.mxu1 %v4148_v32  ;;  %v4200_v32 = vld [vmem:[#allocation7 + $0x4a8] ss:$16 sps:$4 sm:$0xff]  }
 0x20f   : > { %2519 = vmatpush1.bf16.msra.mxu0 %v4137_v30  ;;  %v4293_v30 = vld [vmem:[#allocation9 + $0x40] ss:$8 sps:$4 sm:$0xff]  }
 0x210   : > { %2520 = vmatprep.subr.bf16.mxu0 %v4145_v33  ;;  %v4205_v33 = vld [vmem:[#allocation7 + $0x4cc] ss:$16 sps:$4 sm:$0xff]  }
 0x211   : > { %2603 = vmatpush1.bf16.msra.mxu1 %v4146_v35  ;;  %v4208_v35 = vld [vmem:[#allocation7 + $0x4ec] ss:$16 sps:$4 sm:$0xff]  }
 0x212   : > { %2604 = vmatprep.subr.bf16.mxu1 %v4154_v38  ;;  %v4211_v38 = vld [vmem:[#allocation7 + $0x50c] ss:$16 sps:$4 sm:$0xff]  }
 0x213   : > { %2521 = vmatpush1.bf16.msra.mxu0 %v4143_v36  ;;  %v4206_v36 = vld [vmem:[#allocation7 + $0x4e8] ss:$16 sps:$4 sm:$0xff]  }
 0x214   : > { %2522 = vmatprep.subr.bf16.mxu0 %v4151_v54  ;;  %v4209_v54 = vld [vmem:[#allocation7 + $0x508] ss:$16 sps:$4 sm:$0xff]  }
 0x215   : > { %2605 = vmatpush1.bf16.msra.mxu1 %v4152_v39  ;;  %v4214_v39 = vld [vmem:[#allocation7 + $0x52c] ss:$16 sps:$4 sm:$0xff]  }
 0x216   : > { %2606 = vmatprep.subr.bf16.mxu1 %v4160_v41  ;;  %v4217_v41 = vld [vmem:[#allocation7 + $0x54c] ss:$16 sps:$4 sm:$0xff]  }
 0x217   : > { %2523 = vmatpush1.bf16.msra.mxu0 %v4149_v40  ;;  %v4212_v40 = vld [vmem:[#allocation7 + $0x528] ss:$16 sps:$4 sm:$0xff]  }
 0x218   : > { %2524 = vmatprep.subr.bf16.mxu0 %v4157_v42  ;;  %v4215_v42 = vld [vmem:[#allocation7 + $0x548] ss:$16 sps:$4 sm:$0xff]  }
 0x219   : > { %2607 = vmatpush1.bf16.msra.mxu1 %v4158_v43  ;;  %v4220_v43 = vld [vmem:[#allocation7 + $0x56c] ss:$16 sps:$4 sm:$0xff]  }
 0x21a   : > { %2608 = vmatprep.subr.bf16.mxu1 %v4166_v48  ;;  %v4221_v48 = vld [vmem:[#allocation7 + $0x588] ss:$16 sps:$4 sm:$0xff]  }
 0x21b   : > { %2525 = vmatpush1.bf16.msra.mxu0 %v4155_v46  ;;  %v4223_v46 = vld [vmem:[#allocation7 + $0x58c] ss:$16 sps:$4 sm:$0xff]  }
 0x21c   : > { %2526 = vmatprep.subr.bf16.mxu0 %v4163_v20  ;;  %v4226_v20 = vld [vmem:[#allocation7 + $0x5ac] ss:$16 sps:$4 sm:$0xff]  }
 0x21d   : > { %2609 = vmatpush1.bf16.msra.mxu1 %v4164_v53  ;;  %v4224_v53 = vld [vmem:[#allocation7 + $0x5a8] ss:$16 sps:$4 sm:$0xff]  }
 0x21e   : > { %2610 = vmatprep.subr.bf16.mxu1 %v4172_v61  ;;  %v4232_v61 = vld [vmem:[#allocation7 + $0x5ec] ss:$16 sps:$4 sm:$0xff]  }
 0x21f   : > { %2527 = vmatpush1.bf16.msra.mxu0 %v4161_v8  ;;  %v4227_v8 = vld [vmem:[#allocation7 + $0x5c8] ss:$16 sps:$4 sm:$0xff]  }
 0x220   : > { %2528 = vmatprep.subr.bf16.mxu0 %v4169_v56  ;;  %v4235_v56 = vld [vmem:[#allocation7 + $0x60c] ss:$16 sps:$4 sm:$0xff]  }
 0x221   : > { %2611 = vmatpush1.bf16.msra.mxu1 %v4170_v57  ;;  %v4233_v57 = vld [vmem:[#allocation7 + $0x608] ss:$16 sps:$4 sm:$0xff]  }
 0x222   : > { %2612 = vmatprep.subr.bf16.mxu1 %v4178_v58  ;;  %v4241_v58 = vld [vmem:[#allocation7 + $0x64c] ss:$16 sps:$4 sm:$0xff]  }
 0x223   : > { %2529 = vmatpush1.bf16.msra.mxu0 %v4167_v52  ;;  %v4236_v52 = vld [vmem:[#allocation7 + $0x628] ss:$16 sps:$4 sm:$0xff]  }
 0x224   : > { %2530 = vmatprep.subr.bf16.mxu0 %v4175_v59  ;;  %v4239_v59 = vld [vmem:[#allocation7 + $0x648] ss:$16 sps:$4 sm:$0xff]  }
 0x225   : > { %2613 = vmatpush1.bf16.msra.mxu1 %v4176_v60  ;;  %v4244_v60 = vld [vmem:[#allocation7 + $0x66c] ss:$16 sps:$4 sm:$0xff]  }
 0x226   : > { %2614 = vmatprep.subr.bf16.mxu1 %v4184_v37  ;;  %v4245_v37 = vld [vmem:[#allocation7 + $0x688] ss:$16 sps:$4 sm:$0xff]  }
 0x227   : > { %2531 = vmatpush1.bf16.msra.mxu0 %v4173_v62  ;;  %v4247_v62 = vld [vmem:[#allocation7 + $0x68c] ss:$16 sps:$4 sm:$0xff]  }
 0x228   : > { %2532 = vmatprep.subr.bf16.mxu0 %v4181_v63  ;;  %v4250_v63 = vld [vmem:[#allocation7 + $0x6ac] ss:$16 sps:$4 sm:$0xff]  }
 0x229   : > { %2615 = vmatpush1.bf16.msra.mxu1 %v4182_v1  ;;  %v4253_v1 = vld [vmem:[#allocation7 + $0x6cc] ss:$16 sps:$4 sm:$0xff]  }
 0x22a   : > { %2625 = vmatprep.subr.bf16.mxu1 %v4187_v4 }
 0x22b   : > { %2533 = vmatpush1.bf16.msra.mxu0 %v4179_v2 }
 0x22c   : > { %2617 = vmatmul.mubr.bf16.vlgmr.msra.gmra.mrb[12].mxu1 %v4938_v50  ;;  %3163 = vmatprep.subr.bf16.mxu0 %v4283_v13  ;;  %v4196_v50 = vld [vmem:[#allocation7 + $0x46c] ss:$16 sps:$4 sm:$0xff]  }
 0x22d   : > { %2626 = vmatpush1.bf16.msra.mxu1 %v4185_v0  ;;  %2657 = vmatprep.mubr.bf16.mxu1 %v4959_v31  ;;  %v4290_v31 = vld [vmem:[#allocation9 + $0x30] ss:$8 sps:$4 sm:$0xff]   ;;  %v4256_v13 = vld [vmem:[#allocation7 + $0x6ec] ss:$16 sps:$4 sm:$0xff]  }
 0x22e   : > { %2535 = vmatmul.mubr.bf16.vlgmr.msra.gmra.mrb[8].mxu0 %v4992_v5  ;;  %2627 = vmatprep.subr.bf16.mxu1 %v4190_v12  ;;  %v4251_v12 = vld [vmem:[#allocation7 + $0x6c8] ss:$16 sps:$4 sm:$0xff]  }
 0x22f   : > { %3164 = vmatpush1.bf16.msra.mxu0 %v4281_v49 }
 0x230   : > { %3165 = vmatprep.subr.bf16.mxu0 %v4286_v15  ;;  %v4299_v15 = vld [vmem:[#allocation9 + $0x60] ss:$8 sps:$4 sm:$0xff]  }
 0x231   : > { %2628 = vmatpush1.bf16.msra.mxu1 %v4188_v14  ;;  %v4301_v14 = vld [vmem:[#allocation9 + $0x64] ss:$8 sps:$4 sm:$0xff]  }
 0x232   : > { %2629 = vmatprep.subr.bf16.mxu1 %v4193_v25  ;;  %v4254_v25 = vld [vmem:[#allocation7 + $0x6e8] ss:$16 sps:$4 sm:$0xff]  }
 0x233   : > { %3166 = vmatpush1.bf16.msra.mxu0 %v4284_v16  ;;  %v4259_v16 = vld [vmem:[#allocation7 + $0x70c] ss:$16 sps:$4 sm:$0xff]  }
 0x234   : > { %3167 = vmatprep.subr.bf16.mxu0 %v4289_v19  ;;  %v4302_v19 = vld [vmem:[#allocation9 + $0x70] ss:$8 sps:$4 sm:$0xff]  }
 0x235   : > { %2630 = vmatpush1.bf16.msra.mxu1 %v4191_v18  ;;  %v4304_v18 = vld [vmem:[#allocation9 + $0x74] ss:$8 sps:$4 sm:$0xff]  }
 0x236   : > { %2631 = vmatprep.subr.bf16.mxu1 %v4196_v50  ;;  %v4257_v50 = vld [vmem:[#allocation7 + $0x708] ss:$16 sps:$4 sm:$0xff]  }
 0x237   : > { %3168 = vmatpush1.bf16.msra.mxu0 %v4287_v22  ;;  %v4262_v22 = vld [vmem:[#allocation7 + $0x72c] ss:$16 sps:$4 sm:$0xff]  }
 0x238   : > { %3169 = vmatprep.subr.bf16.mxu0 %v4292_v24  ;;  %v4305_v24 = vld [vmem:[#allocation9 + $0x80] ss:$8 sps:$4 sm:$0xff]  }
 0x239   : > { %2632 = vmatpush1.bf16.msra.mxu1 %v4194_v23  ;;  %v4307_v23 = vld [vmem:[#allocation9 + $0x84] ss:$8 sps:$4 sm:$0xff]  }
 0x23a   : > { %2633 = vmatprep.subr.bf16.mxu1 %v4199_v26  ;;  %v4260_v26 = vld [vmem:[#allocation7 + $0x728] ss:$16 sps:$4 sm:$0xff]  }
 0x23b   : > { %3170 = vmatpush1.bf16.msra.mxu0 %v4290_v31  ;;  %v4265_v31 = vld [vmem:[#allocation7 + $0x74c] ss:$16 sps:$4 sm:$0xff]  }
 0x23c   : > { %3171 = vmatprep.subr.bf16.mxu0 %v4295_v28  ;;  %v4308_v28 = vld [vmem:[#allocation9 + $0x90] ss:$8 sps:$4 sm:$0xff]  }
 0x23d   : > { %2634 = vmatpush1.bf16.msra.mxu1 %v4197_v27  ;;  %v4310_v27 = vld [vmem:[#allocation9 + $0x94] ss:$8 sps:$4 sm:$0xff]  }
 0x23e   : > { %2635 = vmatprep.subr.bf16.mxu1 %v4202_v29  ;;  %v4263_v29 = vld [vmem:[#allocation7 + $0x748] ss:$16 sps:$4 sm:$0xff]  }
 0x23f   : > { %3172 = vmatpush1.bf16.msra.mxu0 %v4293_v30  ;;  %v4268_v30 = vld [vmem:[#allocation7 + $0x76c] ss:$16 sps:$4 sm:$0xff]  }
 0x241   : > { %2636 = vmatpush1.bf16.msra.mxu1 %v4200_v32  ;;  %v4313_v32 = vld [vmem:[#allocation9 + $0xa4] ss:$8 sps:$4 sm:$0xff]  }
 0x242   : > { %2637 = vmatprep.subr.bf16.mxu1 %v4205_v33  ;;  %v4311_v33 = vld [vmem:[#allocation9 + $0xa0] ss:$8 sps:$4 sm:$0xff]  }
 0x245   : > { %2638 = vmatpush1.bf16.msra.mxu1 %v4203_v34  ;;  %v4266_v34 = vld [vmem:[#allocation7 + $0x768] ss:$16 sps:$4 sm:$0xff]  }
 0x246   : > { %2639 = vmatprep.subr.bf16.mxu1 %v4208_v35  ;;  %v4271_v35 = vld [vmem:[#allocation7 + $0x78c] ss:$16 sps:$4 sm:$0xff]  }
 0x249   : > { %2640 = vmatpush1.bf16.msra.mxu1 %v4206_v36  ;;  %v4316_v36 = vld [vmem:[#allocation9 + $0xb4] ss:$8 sps:$4 sm:$0xff]  }
 0x24a   : > { %2641 = vmatprep.subr.bf16.mxu1 %v4211_v38  ;;  %v4314_v38 = vld [vmem:[#allocation9 + $0xb0] ss:$8 sps:$4 sm:$0xff]  }
 0x24d   : > { %2642 = vmatpush1.bf16.msra.mxu1 %v4209_v54  ;;  %v4269_v54 = vld [vmem:[#allocation7 + $0x788] ss:$16 sps:$4 sm:$0xff]  }
 0x24e   : > { %2643 = vmatprep.subr.bf16.mxu1 %v4214_v39  ;;  %v4274_v39 = vld [vmem:[#allocation7 + $0x7ac] ss:$16 sps:$4 sm:$0xff]  }
 0x251   : > { %2644 = vmatpush1.bf16.msra.mxu1 %v4212_v40  ;;  %v4319_v40 = vld [vmem:[#allocation9 + $0xc4] ss:$8 sps:$4 sm:$0xff]  }
 0x252   : > { %2645 = vmatprep.subr.bf16.mxu1 %v4217_v41  ;;  %v4317_v41 = vld [vmem:[#allocation9 + $0xc0] ss:$8 sps:$4 sm:$0xff]  }
 0x255   : > { %2646 = vmatpush1.bf16.msra.mxu1 %v4215_v42  ;;  %v4272_v42 = vld [vmem:[#allocation7 + $0x7a8] ss:$16 sps:$4 sm:$0xff]  }
 0x256   : > { %2647 = vmatprep.subr.bf16.mxu1 %v4220_v43  ;;  %v4277_v43 = vld [vmem:[#allocation7 + $0x7cc] ss:$16 sps:$4 sm:$0xff]  }
 0x259   : > { %2648 = vmatpush1.bf16.msra.mxu1 %v4218_v45  ;;  %v4322_v45 = vld [vmem:[#allocation9 + $0xd4] ss:$8 sps:$4 sm:$0xff]  }
 0x25a   : > { %2649 = vmatprep.subr.bf16.mxu1 %v4223_v46  ;;  %v4320_v46 = vld [vmem:[#allocation9 + $0xd0] ss:$8 sps:$4 sm:$0xff]  }
 0x25d   : > { %2650 = vmatpush1.bf16.msra.mxu1 %v4221_v48  ;;  %v4275_v48 = vld [vmem:[#allocation7 + $0x7c8] ss:$16 sps:$4 sm:$0xff]  }
 0x25e   : > { %2651 = vmatprep.subr.bf16.mxu1 %v4226_v20  ;;  %v4280_v20 = vld [vmem:[#allocation7 + $0x7ec] ss:$16 sps:$4 sm:$0xff]  }
 0x261   : > { %2652 = vmatpush1.bf16.msra.mxu1 %v4224_v53  ;;  %v4325_v53 = vld [vmem:[#allocation9 + $0xe4] ss:$8 sps:$4 sm:$0xff]  }
 0x262   : > { %2653 = vmatprep.subr.bf16.mxu1 %v4229_v17  ;;  %v4323_v17 = vld [vmem:[#allocation9 + $0xe0] ss:$8 sps:$4 sm:$0xff]  }
 0x265   : > { %2654 = vmatpush1.bf16.msra.mxu1 %v4227_v8  ;;  %v4278_v8 = vld [vmem:[#allocation7 + $0x7e8] ss:$16 sps:$4 sm:$0xff]  }
 0x266   : > { %2655 = vmatprep.subr.bf16.mxu1 %v4232_v61  ;;  %v4326_v61 = vld [vmem:[#allocation9 + $0xf0] ss:$8 sps:$4 sm:$0xff]  }
 0x269   : > { %2656 = vmatpush1.bf16.msra.mxu1 %v4230_v21  ;;  %v4328_v21 = vld [vmem:[#allocation9 + $0xf4] ss:$8 sps:$4 sm:$0xff]  }
 0x26a   : > { %2666 = vmatprep.subr.bf16.mxu1 %v4235_v56  ;;  %v4331_v56 = vld [vmem:[#allocation9 + $0x104] ss:$8 sps:$4 sm:$0xff]  }
 0x26c   : > { %2658 = vmatmul.mubr.bf16.vlgmr.msra.gmra.mrb[12].mxu1 %v4976_v47  ;;  %v4248_v47 = vld [vmem:[#allocation7 + $0x6a8] ss:$16 sps:$4 sm:$0xff]  }
 0x26d   : > { %2667 = vmatpush1.bf16.msra.mxu1 %v4233_v57  ;;  %2698 = vmatprep.mubr.bf16.mxu1 %v4983_v55  ;;  %v4298_v55 = vld [vmem:[#allocation9 + $0x54] ss:$8 sps:$4 sm:$0xff]  }
 0x26e   : > { %2668 = vmatprep.subr.bf16.mxu1 %v4238_v44  ;;  %3173 = vmatprep.subr.bf16.mxu0 %v4298_v55  ;;  %v5004_v57 = vld [vmem:[#allocation4 + $0x8] sm:$0xf] }
 0x26f   : > { %3174 = vmatpush1.bf16.msra.mxu0 %v4296_v3  ;;  %v1082_v44 = vrot.slane %v5004_v57, %v4881_v7 }
 0x270   : > { %3175 = vmatprep.subr.bf16.mxu0 %v4301_v14 }
 0x271   : > { %2669 = vmatpush1.bf16.msra.mxu1 %v4236_v52  ;;  %v1086_v52 = vrot.slane %v5004_v57, %v4887_v10 }
 0x272   : > { %2670 = vmatprep.subr.bf16.mxu1 %v4241_v58 }
 0x273   : > { %3176 = vmatpush1.bf16.msra.mxu0 %v4299_v15 }
 0x274   : > { %3177 = vmatprep.subr.bf16.mxu0 %v4304_v18 }
 0x275   : > { %2671 = vmatpush1.bf16.msra.mxu1 %v4239_v59 }
 0x276   : > { %2672 = vmatprep.subr.bf16.mxu1 %v4244_v60 }
 0x277   : > { %3178 = vmatpush1.bf16.msra.mxu0 %v4302_v19 }
 0x278   : > { %3179 = vmatprep.subr.bf16.mxu0 %v4307_v23 }
 0x279   : > { %2673 = vmatpush1.bf16.msra.mxu1 %v4242_v51 }
 0x27a   : > { %2674 = vmatprep.subr.bf16.mxu1 %v4247_v62 }
 0x27b   : > { %3180 = vmatpush1.bf16.msra.mxu0 %v4305_v24 }
 0x27c   : > { %3181 = vmatprep.subr.bf16.mxu0 %v4310_v27 }
 0x27d   : > { %2675 = vmatpush1.bf16.msra.mxu1 %v4245_v37 }
 0x27e   : > { %2676 = vmatprep.subr.bf16.mxu1 %v4250_v63 }
 0x27f   : > { %v4999_v2 = vpop.f32.mrb[8].mxu1  ;;  %3182 = vmatpush1.bf16.msra.mxu0 %v4308_v28 }
 0x280   : > { %v5001_v4 = vpop.f32.mrb[9].mxu1  ;;  %3183 = vmatprep.subr.bf16.mxu0 %v4313_v32  ;;  %v2414_v58 = vadd.f32 %v4999_v2, %v1082_v44  ;;  %v4359_v44 = vld [vmem:[#allocation9 + $0x1a0] ss:$8 sps:$4 sm:$0xff]  }
 0x281   : > { %2677 = vmatpush1.bf16.msra.mxu1 %v4248_v47  ;;  %v2417_v0 = vpop.f32.mrb[10].mxu1  ;;  %v2416_v59 = vadd.f32 %v5001_v4, %v1086_v52  ;;  %v4364_v52 = vld [vmem:[#allocation9 + $0x1b4] ss:$8 sps:$4 sm:$0xff]  }
 0x282   : > { %v2418_v49 = vpop.f32.mrb[11].mxu1  ;;  %2678 = vmatprep.subr.bf16.mxu1 %v4253_v1 }
 0x283   : > { %3184 = vmatpush1.bf16.msra.mxu0 %v4311_v33  ;;  %v4329_v33 = vld [vmem:[#allocation9 + $0x100] ss:$8 sps:$4 sm:$0xff]  }
 0x284   : > { %3185 = vmatprep.subr.bf16.mxu0 %v4316_v36  ;;  %v4332_v36 = vld [vmem:[#allocation9 + $0x110] ss:$8 sps:$4 sm:$0xff]  }
 0x285   : > { %2679 = vmatpush1.bf16.msra.mxu1 %v4251_v12 }
 0x286   : > { %2680 = vmatprep.subr.bf16.mxu1 %v4256_v13 }
 0x287   : > { %3186 = vmatpush1.bf16.msra.mxu0 %v4314_v38  ;;  %v4337_v38 = vld [vmem:[#allocation9 + $0x124] ss:$8 sps:$4 sm:$0xff]  }
 0x288   : > { %3187 = vmatprep.subr.bf16.mxu0 %v4319_v40  ;;  %v4338_v40 = vld [vmem:[#allocation9 + $0x130] ss:$8 sps:$4 sm:$0xff]  }
 0x289   : > { %2681 = vmatpush1.bf16.msra.mxu1 %v4254_v25 }
 0x28a   : > { %2682 = vmatprep.subr.bf16.mxu1 %v4259_v16 }
 0x28b   : > { %3188 = vmatpush1.bf16.msra.mxu0 %v4317_v41  ;;  %v4343_v41 = vld [vmem:[#allocation9 + $0x144] ss:$8 sps:$4 sm:$0xff]  }
 0x28c   : > { %3189 = vmatprep.subr.bf16.mxu0 %v4322_v45  ;;  %v4344_v45 = vld [vmem:[#allocation9 + $0x150] ss:$8 sps:$4 sm:$0xff]  }
 0x28d   : > { %2683 = vmatpush1.bf16.msra.mxu1 %v4257_v50 }
 0x28e   : > { %2684 = vmatprep.subr.bf16.mxu1 %v4262_v22 }
 0x28f   : > { %3190 = vmatpush1.bf16.msra.mxu0 %v4320_v46  ;;  %v4349_v46 = vld [vmem:[#allocation9 + $0x164] ss:$8 sps:$4 sm:$0xff]  }
 0x290   : > { %3191 = vmatprep.subr.bf16.mxu0 %v4325_v53  ;;  %v4350_v53 = vld [vmem:[#allocation9 + $0x170] ss:$8 sps:$4 sm:$0xff]  }
 0x291   : > { %2685 = vmatpush1.bf16.msra.mxu1 %v4260_v26 }
 0x292   : > { %2686 = vmatprep.subr.bf16.mxu1 %v4265_v31 }
 0x293   : > { %3192 = vmatpush1.bf16.msra.mxu0 %v4323_v17  ;;  %v4355_v17 = vld [vmem:[#allocation9 + $0x184] ss:$8 sps:$4 sm:$0xff]  }
 0x294   : > { %3193 = vmatprep.subr.bf16.mxu0 %v4328_v21  ;;  %v4356_v21 = vld [vmem:[#allocation9 + $0x190] ss:$8 sps:$4 sm:$0xff]  }
 0x295   : > { %2687 = vmatpush1.bf16.msra.mxu1 %v4263_v29 }
 0x296   : > { %2688 = vmatprep.subr.bf16.mxu1 %v4268_v30 }
 0x297   : > { %3194 = vmatpush1.bf16.msra.mxu0 %v4326_v61  ;;  %v4358_v61 = vld [vmem:[#allocation9 + $0x194] ss:$8 sps:$4 sm:$0xff]  }
 0x298   : > { %3204 = vmatprep.subr.bf16.mxu0 %v4331_v56  ;;  %v4361_v56 = vld [vmem:[#allocation9 + $0x1a4] ss:$8 sps:$4 sm:$0xff]  }
 0x299   : > { %2689 = vmatpush1.bf16.msra.mxu1 %v4266_v34 }
 0x29a   : > { %2690 = vmatprep.subr.bf16.mxu1 %v4271_v35  ;;  %v4334_v35 = vld [vmem:[#allocation9 + $0x114] ss:$8 sps:$4 sm:$0xff]  }
 0x29d   : > { %2691 = vmatpush1.bf16.msra.mxu1 %v4269_v54  ;;  %v4335_v54 = vld [vmem:[#allocation9 + $0x120] ss:$8 sps:$4 sm:$0xff]  }
 0x29e   : > { %2692 = vmatprep.subr.bf16.mxu1 %v4274_v39  ;;  %v4340_v39 = vld [vmem:[#allocation9 + $0x134] ss:$8 sps:$4 sm:$0xff]  }
 0x2a1   : > { %2693 = vmatpush1.bf16.msra.mxu1 %v4272_v42  ;;  %v4341_v42 = vld [vmem:[#allocation9 + $0x140] ss:$8 sps:$4 sm:$0xff]  }
 0x2a2   : > { %2694 = vmatprep.subr.bf16.mxu1 %v4277_v43  ;;  %v4346_v43 = vld [vmem:[#allocation9 + $0x154] ss:$8 sps:$4 sm:$0xff]  }
 0x2a5   : > { %2695 = vmatpush1.bf16.msra.mxu1 %v4275_v48  ;;  %v4347_v48 = vld [vmem:[#allocation9 + $0x160] ss:$8 sps:$4 sm:$0xff]  }
 0x2a6   : > { %2696 = vmatprep.subr.bf16.mxu1 %v4280_v20  ;;  %v4352_v20 = vld [vmem:[#allocation9 + $0x174] ss:$8 sps:$4 sm:$0xff]  }
 0x2a9   : > { %2697 = vmatpush1.bf16.msra.mxu1 %v4278_v8  ;;  %v4353_v8 = vld [vmem:[#allocation9 + $0x180] ss:$8 sps:$4 sm:$0xff]  }
 0x2ac   : > { %2699 = vmatmul.mubr.bf16.vlgmr.msra.gmra.mrb[12].mxu1 %v4992_v5 }
 0x301   : > { %v2536_v60 = vpop.f32.mrb[8].mxu0 }
 0x302   : > { %v3779_v51 = vadd.f32 %v2536_v60, %v2414_v58  ;;  %v2538_v62 = vpop.f32.mrb[9].mxu0  ;;  %v4362_v58 = vld [vmem:[#allocation9 + $0x1b0] ss:$8 sps:$4 sm:$0xff]   ;;  %v4365_v60 = vld [vmem:[#allocation9 + $0x1c0] ss:$8 sps:$4 sm:$0xff]  }
 0x303   : > { %v3781_v37 = vadd.f32 %v2538_v62, %v2416_v59  ;;  %v2540_v63 = vpop.f32.mrb[10].mxu0  ;;  %v4367_v59 = vld [vmem:[#allocation9 + $0x1c4] ss:$8 sps:$4 sm:$0xff]   ;;  %v4368_v62 = vld [vmem:[#allocation9 + $0x1d0] ss:$8 sps:$4 sm:$0xff]  }
 0x304   : > { %v2707_v5 = vmin.f32 %v3779_v51, 20.0  ;;  %v2541_v47 = vpop.f32.mrb[11].mxu0  ;;  %vm2751_vm9 = vcmp.gt.f32.partialorder %v3779_v51, 20.0  ;;  %v4371_v63 = vld [vmem:[#allocation9 + $0x1e0] ss:$8 sps:$4 sm:$0xff]  }
 0x305   : > { %v2708_v1 = vmin.f32 %v3781_v37, 20.0  ;;  %vm2752_vm10 = vcmp.gt.f32.partialorder %v3781_v37, 20.0  ;;  %v4374_v47 = vld [vmem:[#allocation9 + $0x1f0] ss:$8 sps:$4 sm:$0xff]  }
 0x306   : > { %v2711_v55 = vmul.f32 1.442695, %v2707_v5  ;;  %v4376_v5 = vld [vmem:[#allocation9 + $0x1f4] ss:$8 sps:$4 sm:$0xff]  }
 0x307   : > { %v2713_v3 = vmul.f32 1.442695, %v2708_v1  ;;  %v1090_v1 = vrot.slane %v5004_v57, %v343_v9 }
 0x308   : > { %4409 = vpow2.f32 %v2711_v55  ;;  %v1094_v55 = vrot.slane %v5004_v57, %v347_v11 }
 0x309   : > { %4411 = vpow2.f32 %v2713_v3 }
 0x312   : > { %v4410_v0 = vpop.eup %4409 }
 0x313   : > { %v4412_v12 = vpop.eup %4411  ;;  %v2727_v49 = vmul.f32 %v4410_v0, %v4410_v0  ;;  %v2731_v13 = vmul.f32 2.0, %v4410_v0  ;;  %v2719_v18 = vadd.f32 2.0, %v4410_v0 }
 0x314   : > { %v2728_v14 = vmul.f32 %v4412_v12, %v4412_v12  ;;  %v2732_v2 = vmul.f32 2.0, %v4412_v12  ;;  %v2720_v19 = vadd.f32 2.0, %v4412_v12 }
 0x315   : > { %v2735_v15 = vadd.f32 %v2731_v13, %v2727_v49  ;;  %v2723_v50 = vmul.f32 %v4410_v0, %v2719_v18 }
 0x316   : > { %v2736_v4 = vadd.f32 %v2732_v2, %v2728_v14  ;;  %v2724_v23 = vmul.f32 %v4412_v12, %v2720_v19 }
 0x317   : > { %v2739_v25 = vadd.f32 2.0, %v2735_v15 }
 0x318   : > { %v2740_v16 = vadd.f32 2.0, %v2736_v4 }
 0x319   : > { %4413 = vrcp.f32 %v2739_v25 }
 0x31a   : > { %4415 = vrcp.f32 %v2740_v16 }
 0x323   : > { %v4414_v22 = vpop.eup %4413 }
 0x324   : > { %v4416_v24 = vpop.eup %4415  ;;  %v2747_v26 = vmul.f32 %v4414_v22, %v2723_v50 }
 0x325   : > { %v2748_v31 = vmul.f32 %v4416_v24, %v2724_v23 }
 0x326   : > { %v2755_v27 = vmul.f32 %v3779_v51, %v2747_v26 }
 0x327   : > { %v2756_v28 = vmul.f32 %v3781_v37, %v2748_v31 }
 0x328   : > { %v2759_v29 = vsel %vm2751_vm9, %v3779_v51, %v2755_v27  ;;  %v4370_v51 = vld [vmem:[#allocation9 + $0x1d4] ss:$8 sps:$4 sm:$0xff]  }
 0x329   : > { %v2760_v30 = vsel %vm2752_vm10, %v3781_v37, %v2756_v28  ;;  %v2763_v34 = vpack.c.bf16 %v2759_v29, %v2759_v29  ;;  %v4373_v37 = vld [vmem:[#allocation9 + $0x1e4] ss:$8 sps:$4 sm:$0xff]  }
 0x32a   : > { %v2764_v32 = vpack.c.bf16 %v2760_v30, %v2760_v30 }
 0x32c   : > { %3195 = vmatprep.mubr.bf16.mxu0 %v2764_v32 }
 0x32d   : > { %3196 = vmatmul.mubr.bf16.vlgmr.msra.gmra.mrb[12].mxu0 %v2763_v34 }
 0x32e   : > { %3205 = vmatpush1.bf16.msra.mxu0 %v4329_v33 }
 0x32f   : > { %3206 = vmatprep.subr.bf16.mxu0 %v4334_v35 }
 0x332   : > { %3207 = vmatpush1.bf16.msra.mxu0 %v4332_v36 }
 0x333   : > { %3208 = vmatprep.subr.bf16.mxu0 %v4337_v38 }
 0x336   : > { %3209 = vmatpush1.bf16.msra.mxu0 %v4335_v54 }
 0x337   : > { %3210 = vmatprep.subr.bf16.mxu0 %v4340_v39  ;;  %v2831_v39 = vld [vmem:[#allocation4 + $0xc] sm:$0x3] }
 0x33a   : > { %3211 = vmatpush1.bf16.msra.mxu0 %v4338_v40  ;;  %v2836_v40 = vrot.slane %v2831_v39, %v4881_v7 }
 0x33b   : > { %3212 = vmatprep.subr.bf16.mxu0 %v4343_v41  ;;  %v2840_v41 = vrot.slane %v2831_v39, %v4887_v10 }
 0x33e   : > { %3213 = vmatpush1.bf16.msra.mxu0 %v4341_v42 }
 0x33f   : > { %3214 = vmatprep.subr.bf16.mxu0 %v4346_v43 }
 0x342   : > { %3215 = vmatpush1.bf16.msra.mxu0 %v4344_v45 }
 0x343   : > { %3216 = vmatprep.subr.bf16.mxu0 %v4349_v46 }
 0x346   : > { %3217 = vmatpush1.bf16.msra.mxu0 %v4347_v48 }
 0x347   : > { %3218 = vmatprep.subr.bf16.mxu0 %v4352_v20 }
 0x34a   : > { %3219 = vmatpush1.bf16.msra.mxu0 %v4350_v53 }
 0x34b   : > { %3220 = vmatprep.subr.bf16.mxu0 %v4355_v17 }
 0x34e   : > { %3221 = vmatpush1.bf16.msra.mxu0 %v4353_v8 }
 0x34f   : > { %3222 = vmatprep.subr.bf16.mxu0 %v4358_v61 }
 0x352   : > { %3223 = vmatpush1.bf16.msra.mxu0 %v4356_v21 }
 0x353   : > { %3224 = vmatprep.subr.bf16.mxu0 %v4361_v56 }
 0x356   : > { %3225 = vmatpush1.bf16.msra.mxu0 %v4359_v44 }
 0x357   : > { %3226 = vmatprep.subr.bf16.mxu0 %v4364_v52 }
 0x35a   : > { %3227 = vmatpush1.bf16.msra.mxu0 %v4362_v58 }
 0x35b   : > { %3228 = vmatprep.subr.bf16.mxu0 %v4367_v59 }
 0x35e   : > { %3229 = vmatpush1.bf16.msra.mxu0 %v4365_v60 }
 0x35f   : > { %3230 = vmatprep.subr.bf16.mxu0 %v4370_v51 }
 0x362   : > { %3231 = vmatpush1.bf16.msra.mxu0 %v4368_v62 }
 0x363   : > { %3232 = vmatprep.subr.bf16.mxu0 %v4373_v37 }
 0x366   : > { %3233 = vmatpush1.bf16.msra.mxu0 %v4371_v63 }
 0x367   : > { %3234 = vmatprep.subr.bf16.mxu0 %v4376_v5 }
 0x36a   : > { %3235 = vmatpush1.bf16.msra.mxu0 %v4374_v47 }
 0x37f   : > { %v2700_v3 = vpop.f32.mrb[12].mxu1 }
 0x380   : > { %v3782_v0 = vadd.f32 %v2700_v3, %v1090_v1  ;;  %v2702_v12 = vpop.f32.mrb[13].mxu1  ;;  %v3273_v1 = vld [vmem:[#allocation4 + $0xe] sm:$0x3] }
 0x381   : > { %v3783_v49 = vadd.f32 %v2702_v12, %v1094_v55  ;;  %v2704_v13 = vpop.f32.mrb[14].mxu1 }
 0x382   : > { %v2709_v14 = vmin.f32 %v3782_v0, 20.0  ;;  %v2705_v2 = vpop.f32.mrb[15].mxu1  ;;  %vm2753_vm11 = vcmp.gt.f32.partialorder %v3782_v0, 20.0  ;;  %v3279_v13 = vrot.slane %v3273_v1, %v4881_v7 }
 0x383   : > { %v2710_v15 = vmin.f32 %v3783_v49, 20.0  ;;  %vm2754_vm12 = vcmp.gt.f32.partialorder %v3783_v49, 20.0  ;;  %v3283_v2 = vrot.slane %v3273_v1, %v4887_v10 }
 0x384   : > { %v2715_v4 = vmul.f32 1.442695, %v2709_v14 }
 0x385   : > { %v2717_v25 = vmul.f32 1.442695, %v2710_v15 }
 0x386   : > { %4417 = vpow2.f32 %v2715_v4 }
 0x387   : > { %4419 = vpow2.f32 %v2717_v25 }
 0x390   : > { %v4418_v16 = vpop.eup %4417 }
 0x391   : > { %v4420_v18 = vpop.eup %4419  ;;  %v2729_v19 = vmul.f32 %v4418_v16, %v4418_v16  ;;  %v2733_v9 = vmul.f32 2.0, %v4418_v16  ;;  %v2721_v24 = vadd.f32 2.0, %v4418_v16 }
 0x392   : > { %v2730_v50 = vmul.f32 %v4420_v18, %v4420_v18  ;;  %v2734_v6 = vmul.f32 2.0, %v4420_v18  ;;  %v2722_v26 = vadd.f32 2.0, %v4420_v18 }
 0x393   : > { %v2737_v22 = vadd.f32 %v2733_v9, %v2729_v19  ;;  %v2725_v31 = vmul.f32 %v4418_v16, %v2721_v24  ;;  %v3775_v9 = vld [vmem:[#allocation4 + $0x10] ss:$0 sm:$0xff] }
 0x394   : > { %v2738_v11 = vadd.f32 %v2734_v6, %v2730_v50  ;;  %v2726_v28 = vmul.f32 %v4420_v18, %v2722_v26 }
 0x395   : > { %v2741_v57 = vadd.f32 2.0, %v2737_v22 }
 0x396   : > { %v2742_v23 = vadd.f32 2.0, %v2738_v11 }
 0x397   : > { %4421 = vrcp.f32 %v2741_v57 }
 0x398   : > { %4423 = vrcp.f32 %v2742_v23 }
 0x3a1   : > { %v4422_v27 = vpop.eup %4421 }
 0x3a2   : > { %v4424_v29 = vpop.eup %4423  ;;  %v2749_v30 = vmul.f32 %v4422_v27, %v2725_v31 }
 0x3a3   : > { %v2750_v32 = vmul.f32 %v4424_v29, %v2726_v28 }
 0x3a4   : > { %v2757_v33 = vmul.f32 %v3782_v0, %v2749_v30 }
 0x3a5   : > { %v2758_v34 = vmul.f32 %v3783_v49, %v2750_v32 }
 0x3a6   : > { %v2761_v35 = vsel %vm2753_vm11, %v3782_v0, %v2757_v33 }
 0x3a7   : > { %v2762_v36 = vsel %vm2754_vm12, %v3783_v49, %v2758_v34  ;;  %v2765_v54 = vpack.c.bf16 %v2761_v35, %v2761_v35 }
 0x3a8   : > { %v2766_v38 = vpack.c.bf16 %v2762_v36, %v2762_v36 }
 0x3aa   : > { %3236 = vmatprep.mubr.bf16.mxu0 %v2766_v38 }
 0x3ab   : > { %3237 = vmatmul.mubr.bf16.vlgmr.msra.gmra.mrb[12].mxu0 %v2765_v54 }
 0x47e   : > { %v3238_v42 = vpop.f32.mrb[12].mxu0 }
 0x47f   : > { %v3784_v43 = vadd.f32 %v3238_v42, %v2836_v40  ;;  %v3240_v45 = vpop.f32.mrb[13].mxu0 }
 0x480   : > { %v3785_v46 = vadd.f32 %v3240_v45, %v2840_v41  ;;  %v3242_v48 = vpop.f32.mrb[14].mxu0 }
 0x481   : > { %v3245_v20 = vmin.f32 %v3784_v43, 20.0  ;;  %v3243_v53 = vpop.f32.mrb[15].mxu0  ;;  %vm3267_vm13 = vcmp.gt.f32.partialorder %v3784_v43, 20.0 }
 0x482   : > { %v3246_v17 = vmin.f32 %v3785_v46, 20.0  ;;  %vm3268_vm14 = vcmp.gt.f32.partialorder %v3785_v46, 20.0 }
 0x483   : > { %v3247_v8 = vmul.f32 1.442695, %v3245_v20 }
 0x484   : > { %v3249_v61 = vmul.f32 1.442695, %v3246_v17 }
 0x485   : > { %4425 = vpow2.f32 %v3247_v8 }
 0x486   : > { %4427 = vpow2.f32 %v3249_v61 }
 0x48f   : > { %v4426_v21 = vpop.eup %4425 }
 0x490   : > { %v4428_v56 = vpop.eup %4427  ;;  %v3255_v44 = vmul.f32 %v4426_v21, %v4426_v21  ;;  %v3257_v52 = vmul.f32 2.0, %v4426_v21  ;;  %v3251_v63 = vadd.f32 2.0, %v4426_v21 }
 0x491   : > { %v3256_v58 = vmul.f32 %v4428_v56, %v4428_v56  ;;  %v3258_v59 = vmul.f32 2.0, %v4428_v56  ;;  %v3252_v5 = vadd.f32 2.0, %v4428_v56 }
 0x492   : > { %v3259_v60 = vadd.f32 %v3257_v52, %v3255_v44  ;;  %v3253_v47 = vmul.f32 %v4426_v21, %v3251_v63 }
 0x493   : > { %v3260_v51 = vadd.f32 %v3258_v59, %v3256_v58  ;;  %v3254_v3 = vmul.f32 %v4428_v56, %v3252_v5 }
 0x494   : > { %v3261_v62 = vadd.f32 2.0, %v3259_v60 }
 0x495   : > { %v3262_v37 = vadd.f32 2.0, %v3260_v51 }
 0x496   : > { %4429 = vrcp.f32 %v3261_v62 }
 0x497   : > { %4431 = vrcp.f32 %v3262_v37 }
 0x4a0   : > { %v4430_v55 = vpop.eup %4429 }
 0x4a1   : > { %v4432_v0 = vpop.eup %4431  ;;  %v3265_v12 = vmul.f32 %v4430_v55, %v3253_v47 }
 0x4a2   : > { %v3266_v49 = vmul.f32 %v4432_v0, %v3254_v3 }
 0x4a3   : > { %v3269_v14 = vmul.f32 %v3784_v43, %v3265_v12 }
 0x4a4   : > { %v3270_v15 = vmul.f32 %v3785_v46, %v3266_v49 }
 0x4a5   : > { %v3271_v4 = vsel %vm3267_vm13, %v3784_v43, %v3269_v14 }
 0x4a6   : > { %v3272_v25 = vsel %vm3268_vm14, %v3785_v46, %v3270_v15  ;;  %v3286_v16 = vmul.f32 %v3279_v13, %v3271_v4 }
 0x4a7   : > { %v3287_v18 = vmul.f32 %v3283_v2, %v3272_v25 }
 0x4a9   : > { %v3288_v19 = vadd.f32 %v3287_v18, %v3286_v16 }
 0x4ab   : > { %3289 = vadd.xlane.f32.xlu0 %v3288_v19 }
 0x538   : > { %v3290_v7 = vpop.xlane.xlu0 %3289 }
 0x539   : > { %v3297_v10 = vadd.f32 %v3775_v9, %v3290_v7 }
 0x53b   : > { %3299 = vst.msk [vmem:[%s295_s17] sm:$0xff] %vm3298_vm15, %v3297_v10 }
 0x53c PF: > { %p17_p1 = scmp.ge.s32.totalorder %s4792_s7, 4   ;;  %s5059_s18 = smov %s4609_s19 }
 0x53d   : > { %s5060_s19 = smov %s4613_s20  ;;  %s5061_s20 = smov %s4804_s23 }
 0x53e   : > { %s5062_s21 = smov %s4792_s7  ;;  %19 = sbr.rel (!%p17_p1) target bundleno = 5 (0x5), region = 96 }
 0x545   :  { %3319 = vsyncpa [#allocation3], 1 }
 0x546   :  { %3321 = vsyncpa [#allocation3 + $0x1], 1 }
 0x547   :  { %3322 = vsyncpa [#allocation5], 1 }
 0x548   :  { %3323 = vsyncpa [#allocation8], 1 }

</bundles_post_ra>
